<compile_context>
chip_gen: v5e
topology: v5e:2x2
jax: 0.10.0
libtpu: 0.0.40
codegen_flags: <defaults>
</compile_context>

<pallas_src>
import functools

import jax
import jax.numpy as jnp
from jax.experimental import pallas as pl
from jax.experimental.pallas import tpu as pltpu


def _round_up(x, m):
    return (x + m - 1) // m * m


# ---------------------------------------------------------------------------
# Fused Pallas kernel: merged-encoder conv3x3 -> relu -> decoder conv3x3 -> tanh
# One (batch, row-tile) pair per grid step.
# ---------------------------------------------------------------------------
def _fused_kernel(x_ref, we_ref, be_ref, wd_ref, bd_ref, o_ref, col_ref,
                  *, H, W, T):
    """
    x_ref  : (1, 1, Cin, Lp)  f32 halo'd input row-slab (T+4 image rows, row-
                              major flattened, zero lane-padded up to Lp)
    we_ref : (Chid, 9*Cin)    bf16 merged-encoder weight (tap-major, ch-minor)
    be_ref : (Chid, 1)        f32 merged-encoder bias (ba + bb)
    wd_ref : (Cout, 9*Chid)   bf16 decoder weight
    bd_ref : (Cout, 1)        f32 decoder bias
    o_ref  : (1, Cout, T*W)   f32 output row-tile (lane-dense store)
    col_ref: (9*max(Cin,Chid), Lp) bf16 shared im2col scratch
    """
    Lp = x_ref.shape[-1]
    Cin = x_ref.shape[2]
    Chid = we_ref.shape[0]
    r0 = pl.program_id(1) * T                  # first output image row of tile

    # Lane index helpers over the flattened slab.
    idx = jax.lax.broadcasted_iota(jnp.int32, (1, Lp), 1)
    if (W & (W - 1)) == 0:                     # fixed precedence bug
        xx = idx & (W - 1)                     # column within a row
        rr = idx >> (W.bit_length() - 1)       # row within the slab
    else:
        xx = idx % W
        rr = idx // W
    m_left = (xx >= 1).astype(jnp.float32)     # dx = -1 tap stays inside row
    m_right = (xx <= W - 2).astype(jnp.float32)  # dx = +1 tap stays inside row

    # Hidden rows outside the real image must be zero so the decoder conv sees
    # "same" zero padding at the top/bottom image edges.
    abs_row = r0 - 2 + rr
    row_ok = ((abs_row >= 0) & (abs_row < H)).astype(jnp.float32)

    def im2col(x, c):
        # x: (c, Lp) f32.  Writes the 9 shifted taps (store-time cast to bf16)
        # into col_ref rows [tap*c, (tap+1)*c).  pltpu.roll == jnp.roll, so
        # shift = (-s) % Lp gives shifted[q] = x[q + s].  Column masks zero
        # taps that would wrap across a row; the 2 halo rows at the top and
        # bottom of the slab absorb the row wrap-around, and the image-edge
        # rows are handled by the zero halo (encoder) / row_ok (decoder).
        for ky in range(3):
            for kx in range(3):
                tap = ky * 3 + kx
                s = (ky - 1) * W + (kx - 1)    # flat spatial tap offset
                v = x if s == 0 else pltpu.roll(x, shift=(-s) % Lp, axis=1)
                if kx == 0:
                    v = v * m_left
                elif kx == 2:
                    v = v * m_right
                col_ref[tap * c:(tap + 1) * c, :] = v.astype(jnp.bfloat16)

    # Merged encoder conv: ONE MXU matmul, K = 9*Cin (bf16 x bf16 -> f32 acc).
    im2col(x_ref[0, 0], Cin)
    fe = jnp.dot(we_ref[...], col_ref[0:9 * Cin, :],
                 preferred_element_type=jnp.float32) + be_ref[...]
    h = jnp.maximum(fe, 0.0) * row_ok          # relu(encA + encB), edge rows -> 0

    # Decoder conv + tanh.
    im2col(h, Chid)
    dec = jnp.dot(wd_ref[...], col_ref[0:9 * Chid, :],
                  preferred_element_type=jnp.float32) + bd_ref[...]
    out = jnp.tanh(dec)                        # (Cout, Lp)
    # Middle T rows of the slab are this tile's output rows.
    o_ref[0] = out[:, 2 * W:(T + 2) * W].astype(o_ref.dtype)


# ---------------------------------------------------------------------------
# pallas_call wrapper
# ---------------------------------------------------------------------------
def _fused_forward_pallas(params, slabs, H, W, tile_rows):
    N, nT, cin, Lp = slabs.shape
    hidden = params["enc_w"].shape[0]
    out_pad = params["dec_b"].shape[0]
    T = tile_rows
    cmax = max(cin, hidden)

    # Explicit VMEM budget (scoped default is only 16 MiB v5e / 32 MiB v6e,v7x).
    est = (2 * cin * Lp * 4                    # double-buffered input slab
           + 2 * out_pad * T * W * 4           # double-buffered output tile
           + (hidden * 9 * cin + out_pad * 9 * hidden) * 2   # bf16 weights
           + 9 * cmax * Lp * 2                 # bf16 im2col scratch
           + 4 * (hidden + out_pad) * Lp * 4)  # f32 working values headroom
    vmem_limit = int(min(max(2 * est, 32 << 20), 100 << 20))

    kernel = functools.partial(_fused_kernel, H=H, W=W, T=T)
    return pl.pallas_call(
        kernel,
        out_shape=jax.ShapeDtypeStruct((N, out_pad, H * W), jnp.float32),
        grid=(N, nT),
        in_specs=[
            pl.BlockSpec((1, 1, cin, Lp), lambda n, t: (n, t, 0, 0)),
            pl.BlockSpec((hidden, 9 * cin), lambda n, t: (0, 0)),
            pl.BlockSpec((hidden, 1), lambda n, t: (0, 0)),
            pl.BlockSpec((out_pad, 9 * hidden), lambda n, t: (0, 0)),
            pl.BlockSpec((out_pad, 1), lambda n, t: (0, 0)),
        ],
        out_specs=pl.BlockSpec((1, out_pad, T * W), lambda n, t: (n, 0, t)),
        scratch_shapes=[pltpu.VMEM((9 * cmax, Lp), jnp.bfloat16)],
        compiler_params=pltpu.CompilerParams(
            dimension_semantics=("parallel", "parallel"),
            vmem_limit_bytes=vmem_limit),
    )(slabs, params["enc_w"], params["enc_b"],
      params["dec_w"], params["dec_b"])


def _pick_tile_rows(H, W, cin_pad, hidden_pad, budget_bytes=24 << 20):
    """Largest row-tile whose per-step working set fits a per-generation budget
    (~24 MiB keeps col scratch + slabs comfortably inside v7x's 64 MiB VMEM)."""
    cmax = max(cin_pad, hidden_pad)
    candidates = [t for t in range(H, 0, -1)
                  if H % t == 0 and (t == H or (t * W) % 128 == 0)]
    for t in candidates:
        lp = _round_up((t + 4) * W, 128)
        need = 9 * cmax * lp * 2 + (2 * cin_pad + 4 * hidden_pad) * lp * 4
        if need <= budget_bytes:
            return t
    return candidates[-1]


@functools.partial(jax.jit, static_argnames=("pose_c", "out_c", "tile_rows"))
def transposenet_forward(params, p1bp1, bp1bp2, *, pose_c, out_c,
                         tile_rows=None):
    """Equivalent of TransposeNet.forward(): out_img = netG(P1BP1, BP1BP2).

    Inputs / output are NCHW (PyTorch convention)."""
    N, _, H, W = p1bp1.shape
    # Merged single-stream input cat(P1, BP1, BP2); BP1 appears in both
    # original streams, its weight blocks were summed at init time.
    xm = jnp.concatenate([p1bp1, bp1bp2[:, pose_c:]], axis=1)
    cin = xm.shape[1]
    cin_pad = _round_up(cin, 16)               # bf16 sublane-pack alignment
    if cin_pad != cin:
        xm = jnp.pad(xm, ((0, 0), (0, cin_pad - cin), (0, 0), (0, 0)))

    hidden_pad = params["enc_w"].shape[0]
    if tile_rows is None:
        tile_rows = _pick_tile_rows(H, W, cin_pad, hidden_pad)
    T = tile_rows
    assert H % T == 0 and (T == H or (T * W) % 128 == 0), (H, W, T)
    nT = H // T

    # 2-row zero halo top/bottom == "same" padding for the encoder conv.
    xp = jnp.pad(xm, ((0, 0), (0, 0), (2, 2), (0, 0)))
    slabs = jnp.stack([xp[:, :, t * T:t * T + T + 4, :] for t in range(nT)],
                      axis=1).reshape(N, nT, cin_pad, (T + 4) * W)
    Lp = _round_up((T + 4) * W, 128)           # lane-aligned roll axis
    if Lp != (T + 4) * W:
        slabs = jnp.pad(slabs,
                        ((0, 0), (0, 0), (0, 0), (0, Lp - (T + 4) * W)))

    out_flat = _fused_forward_pallas(params, slabs, H, W, T)
    return out_flat[:, :out_c].reshape(N, out_c, H, W)


# ---------------------------------------------------------------------------
# Parameters (stand-in GPoseNet) + pure-JAX two-stream reference
# ---------------------------------------------------------------------------
def init_gposenet_params(key, *, img_c, pose_c, hidden, out_c):
    """Deterministic synthetic params (GPoseNet architecture not available).

    Returns (kernel_params, reference_params).  Kernel weights are stored
    merged (encoder streams fused), channel-padded, tap-major as
    (Cout, 9*Cin_pad) bf16; biases stay f32."""
    ka, kb, kd, kba, kbb, kbd = jax.random.split(key, 6)
    ca = img_c + pose_c                        # encA input channels (P1BP1)
    cb = 2 * pose_c                            # encB input channels (BP1BP2)
    cm = img_c + 2 * pose_c                    # merged channels (P1,BP1,BP2)

    def he(k, cin, cout):
        return ((2.0 / (9 * cin)) ** 0.5 *
                jax.random.normal(k, (cout, 3, 3, cin), jnp.float32))

    wa, wb, wd = he(ka, ca, hidden), he(kb, cb, hidden), he(kd, hidden, out_c)
    ba = 0.1 * jax.random.normal(kba, (hidden,), jnp.float32)
    bb = 0.1 * jax.random.normal(kbb, (hidden,), jnp.float32)
    bd = 0.1 * jax.random.normal(kbd, (out_c,), jnp.float32)

    # Merge the two encoder streams (BP1 weight blocks summed, biases summed).
    wm = jnp.concatenate([wa[..., :img_c],
                          wa[..., img_c:] + wb[..., :pose_c],
                          wb[..., pose_c:]], axis=-1)        # (hidden,3,3,cm)
    bm = ba + bb

    cm_pad = _round_up(cm, 16)
    hid_pad = _round_up(hidden, 16)
    out_pad = _round_up(out_c, 8)

    def pack(w, cin, cin_pad, cout, cout_pad):
        w = jnp.pad(w, ((0, cout_pad - cout), (0, 0), (0, 0),
                        (0, cin_pad - cin)))
        return w.reshape(cout_pad, 9 * cin_pad).astype(jnp.bfloat16)

    params = {
        "enc_w": pack(wm, cm, cm_pad, hidden, hid_pad),
        "enc_b": jnp.pad(bm, (0, hid_pad - hidden)).reshape(hid_pad, 1),
        "dec_w": pack(wd, hidden, hid_pad, out_c, out_pad),
        "dec_b": jnp.pad(bd, (0, out_pad - out_c)).reshape(out_pad, 1),
    }
    ref = {"wa": wa, "ba": ba, "wb": wb, "bb": bb, "wd": wd, "bd": bd}
    return params, ref


def _conv3x3_same(x, w_o33i, b):
    w = jnp.transpose(w_o33i, (0, 3, 1, 2))    # OIHW
    y = jax.lax.conv_general_dilated(
        x, w, window_strides=(1, 1), padding="SAME",
        dimension_numbers=("NCHW", "OIHW", "NCHW"))
    return y + b.reshape(1, -1, 1, 1)


def reference_forward(ref, p1bp1, bp1bp2):
    """Pure-JAX f32 two-stream reference of the stand-in GPoseNet."""
    fa = _conv3x3_same(p1bp1, ref["wa"], ref["ba"])
    fb = _conv3x3_same(bp1bp2, ref["wb"], ref["bb"])
    h = jnp.maximum(fa + fb, 0.0)
    return jnp.tanh(_conv3x3_same(h, ref["wd"], ref["bd"]))


# ---------------------------------------------------------------------------
# Main
# ---------------------------------------------------------------------------
if __name__ == "__main__":
    key = jax.random.PRNGKey(0)
    k_p1, k_bp1, k_bp2, k_params = jax.random.split(key, 4)

    # Small synthetic shapes: batch=2, image channels=3, pose channels=5,
    # spatial=16, hidden=32, out_channels=3.
    N, H, W = 2, 16, 16
    img_c, pose_c, hidden, out_c = 3, 5, 32, 3

    P1 = jax.random.normal(k_p1, (N, img_c, H, W), jnp.float32)
    BP1 = jax.random.normal(k_bp1, (N, pose_c, H, W), jnp.float32)
    BP2 = jax.random.normal(k_bp2, (N, pose_c, H, W), jnp.float32)

    # set_input(): channel-wise concatenation (PyTorch dim=1 of NCHW).
    P1BP1 = jnp.concatenate([P1, BP1], axis=1)      # (N, img_c+pose_c, H, W)
    BP1BP2 = jnp.concatenate([BP1, BP2], axis=1)    # (N, 2*pose_c,     H, W)

    params, ref = init_gposenet_params(
        k_params, img_c=img_c, pose_c=pose_c, hidden=hidden, out_c=out_c)

    # tile_rows=8 -> 2 spatial row-tiles at this toy size, purely to exercise
    # the halo'd row-tile grid axis; tile_rows=None auto-sizes per VMEM budget
    # at realistic resolutions.
    out_img = transposenet_forward(params, P1BP1, BP1BP2,
                                   pose_c=pose_c, out_c=out_c, tile_rows=8)
    out_img = jax.block_until_ready(out_img)

    assert out_img.shape == (N, out_c, H, W), out_img.shape
    assert bool(jnp.all(jnp.isfinite(out_img)))

    # Numerical check against the un-merged f32 two-stream reference
    # (bf16 matmul operands -> compare with a tolerance, not exact equality).
    expected = reference_forward(ref, P1BP1, BP1BP2)
    max_err = float(jnp.max(jnp.abs(out_img - expected)))
    assert max_err < 1e-1, f"max abs error vs f32 reference: {max_err}"

    print("KERNEL_OK")
</pallas_src>

<mosaic_0001>
module attributes {stable_mosaic.version = 11 : i64} {
  func.func @_fused_kernel(%arg0: i32, %arg1: i32, %arg2: memref<1x1x16x256xf32, #tpu.memory_space<vmem>>, %arg3: memref<32x144xbf16, #tpu.memory_space<vmem>>, %arg4: memref<32x1xf32, #tpu.memory_space<vmem>>, %arg5: memref<8x288xbf16, #tpu.memory_space<vmem>>, %arg6: memref<8x1xf32, #tpu.memory_space<vmem>>, %arg7: memref<1x8x128xf32, #tpu.memory_space<vmem>>, %arg8: memref<288x256xbf16, #tpu.memory_space<vmem>>) attributes {dimension_semantics = [#tpu.dimension_semantics<parallel>, #tpu.dimension_semantics<parallel>], iteration_bounds = array<i64: 2, 2>, scalar_prefetch = 0 : i64, scratch_operands = 1 : i64, tpu.core_type = #tpu.core_type<tc>, window_params = [{transform_indices = @transform_0, window_bounds = array<i64: 1, 1, 16, 256>}, {pipeline_mode = #tpu.pipeline_mode<synchronous>, transform_indices = @transform_1, window_bounds = array<i64: 32, 144>}, {pipeline_mode = #tpu.pipeline_mode<synchronous>, transform_indices = @transform_2, window_bounds = array<i64: 32, 1>}, {pipeline_mode = #tpu.pipeline_mode<synchronous>, transform_indices = @transform_3, window_bounds = array<i64: 8, 288>}, {pipeline_mode = #tpu.pipeline_mode<synchronous>, transform_indices = @transform_4, window_bounds = array<i64: 8, 1>}, {transform_indices = @transform_5, window_bounds = array<i64: 1, 8, 128>}]} {
    %c8_i32 = arith.constant 8 : i32
    %0 = arith.muli %arg1, %c8_i32 : i32
    %1 = tpu.iota {dimensions = array<i32: 1>} : vector<1x256xi32>
    %c15_i32 = arith.constant 15 : i32
    %2 = vector.broadcast %c15_i32 : i32 to vector<1x256xi32>
    %3 = arith.andi %1, %2 : vector<1x256xi32>
    %c4_i32 = arith.constant 4 : i32
    %4 = vector.broadcast %c4_i32 : i32 to vector<1x256xi32>
    %5 = arith.shrsi %1, %4 : vector<1x256xi32>
    %c1_i32 = arith.constant 1 : i32
    %6 = vector.broadcast %c1_i32 : i32 to vector<1x256xi32>
    %7 = arith.cmpi sge, %3, %6 : vector<1x256xi32>
    %8 = arith.extui %7 : vector<1x256xi1> to vector<1x256xi32>
    %9 = arith.sitofp %8 : vector<1x256xi32> to vector<1x256xf32>
    %c14_i32 = arith.constant 14 : i32
    %10 = vector.broadcast %c14_i32 : i32 to vector<1x256xi32>
    %11 = arith.cmpi sle, %3, %10 : vector<1x256xi32>
    %12 = arith.extui %11 : vector<1x256xi1> to vector<1x256xi32>
    %13 = arith.sitofp %12 : vector<1x256xi32> to vector<1x256xf32>
    %c2_i32 = arith.constant 2 : i32
    %14 = arith.subi %0, %c2_i32 : i32
    %15 = vector.broadcast %14 : i32 to vector<1x256xi32>
    %16 = arith.addi %15, %5 : vector<1x256xi32>
    %c0_i32 = arith.constant 0 : i32
    %17 = vector.broadcast %c0_i32 : i32 to vector<1x256xi32>
    %18 = arith.cmpi sge, %16, %17 : vector<1x256xi32>
    %c16_i32 = arith.constant 16 : i32
    %19 = vector.broadcast %c16_i32 : i32 to vector<1x256xi32>
    %20 = arith.cmpi slt, %16, %19 : vector<1x256xi32>
    %21 = arith.andi %18, %20 : vector<1x256xi1>
    %22 = arith.extui %21 : vector<1x256xi1> to vector<1x256xi32>
    %23 = arith.sitofp %22 : vector<1x256xi32> to vector<1x256xf32>
    %c0 = arith.constant 0 : index
    %c0_0 = arith.constant 0 : index
    %c0_1 = arith.constant 0 : index
    %c0_2 = arith.constant 0 : index
    %24 = vector.load %arg2[%c0, %c0_0, %c0_1, %c0_2] : memref<1x1x16x256xf32, #tpu.memory_space<vmem>>, vector<1x1x16x256xf32>
    %25 = vector.shape_cast %24 : vector<1x1x16x256xf32> to vector<16x256xf32>
    %c17_i32 = arith.constant 17 : i32
    %26 = tpu.dynamic_rotate %25 by %c17_i32 dim 1 : vector<16x256xf32>, i32 -> vector<16x256xf32>
    %27 = vector.broadcast %9 : vector<1x256xf32> to vector<16x256xf32>
    %28 = arith.mulf %26, %27 : vector<16x256xf32>
    %29 = arith.truncf %28 : vector<16x256xf32> to vector<16x256xbf16>
    %c0_3 = arith.constant 0 : index
    %c0_4 = arith.constant 0 : index
    %30 = vector.load %arg8[%c0_3, %c0_4] : memref<288x256xbf16, #tpu.memory_space<vmem>>, vector<16x256xbf16>
    tpu.vector_store %arg8[%c0_3, %c0_4], %29 {strides = array<i32>} : memref<288x256xbf16, #tpu.memory_space<vmem>>, vector<16x256xbf16>,
    %c16_i32_5 = arith.constant 16 : i32
    %31 = tpu.dynamic_rotate %25 by %c16_i32_5 dim 1 : vector<16x256xf32>, i32 -> vector<16x256xf32>
    %32 = arith.truncf %31 : vector<16x256xf32> to vector<16x256xbf16>
    %c16 = arith.constant 16 : index
    %c0_6 = arith.constant 0 : index
    %33 = vector.load %arg8[%c16, %c0_6] : memref<288x256xbf16, #tpu.memory_space<vmem>>, vector<16x256xbf16>
    tpu.vector_store %arg8[%c16, %c0_6], %32 {strides = array<i32>} : memref<288x256xbf16, #tpu.memory_space<vmem>>, vector<16x256xbf16>,
    %c15_i32_7 = arith.constant 15 : i32
    %34 = tpu.dynamic_rotate %25 by %c15_i32_7 dim 1 : vector<16x256xf32>, i32 -> vector<16x256xf32>
    %35 = vector.broadcast %13 : vector<1x256xf32> to vector<16x256xf32>
    %36 = arith.mulf %34, %35 : vector<16x256xf32>
    %37 = arith.truncf %36 : vector<16x256xf32> to vector<16x256xbf16>
    %c32 = arith.constant 32 : index
    %c0_8 = arith.constant 0 : index
    %38 = vector.load %arg8[%c32, %c0_8] : memref<288x256xbf16, #tpu.memory_space<vmem>>, vector<16x256xbf16>
    tpu.vector_store %arg8[%c32, %c0_8], %37 {strides = array<i32>} : memref<288x256xbf16, #tpu.memory_space<vmem>>, vector<16x256xbf16>,
    %c1_i32_9 = arith.constant 1 : i32
    %39 = tpu.dynamic_rotate %25 by %c1_i32_9 dim 1 : vector<16x256xf32>, i32 -> vector<16x256xf32>
    %40 = vector.broadcast %9 : vector<1x256xf32> to vector<16x256xf32>
    %41 = arith.mulf %39, %40 : vector<16x256xf32>
    %42 = arith.truncf %41 : vector<16x256xf32> to vector<16x256xbf16>
    %c48 = arith.constant 48 : index
    %c0_10 = arith.constant 0 : index
    %43 = vector.load %arg8[%c48, %c0_10] : memref<288x256xbf16, #tpu.memory_space<vmem>>, vector<16x256xbf16>
    tpu.vector_store %arg8[%c48, %c0_10], %42 {strides = array<i32>} : memref<288x256xbf16, #tpu.memory_space<vmem>>, vector<16x256xbf16>,
    %44 = arith.truncf %25 : vector<16x256xf32> to vector<16x256xbf16>
    %c64 = arith.constant 64 : index
    %c0_11 = arith.constant 0 : index
    %45 = vector.load %arg8[%c64, %c0_11] : memref<288x256xbf16, #tpu.memory_space<vmem>>, vector<16x256xbf16>
    tpu.vector_store %arg8[%c64, %c0_11], %44 {strides = array<i32>} : memref<288x256xbf16, #tpu.memory_space<vmem>>, vector<16x256xbf16>,
    %c255_i32 = arith.constant 255 : i32
    %46 = tpu.dynamic_rotate %25 by %c255_i32 dim 1 : vector<16x256xf32>, i32 -> vector<16x256xf32>
    %47 = vector.broadcast %13 : vector<1x256xf32> to vector<16x256xf32>
    %48 = arith.mulf %46, %47 : vector<16x256xf32>
    %49 = arith.truncf %48 : vector<16x256xf32> to vector<16x256xbf16>
    %c80 = arith.constant 80 : index
    %c0_12 = arith.constant 0 : index
    %50 = vector.load %arg8[%c80, %c0_12] : memref<288x256xbf16, #tpu.memory_space<vmem>>, vector<16x256xbf16>
    tpu.vector_store %arg8[%c80, %c0_12], %49 {strides = array<i32>} : memref<288x256xbf16, #tpu.memory_space<vmem>>, vector<16x256xbf16>,
    %c241_i32 = arith.constant 241 : i32
    %51 = tpu.dynamic_rotate %25 by %c241_i32 dim 1 : vector<16x256xf32>, i32 -> vector<16x256xf32>
    %52 = vector.broadcast %9 : vector<1x256xf32> to vector<16x256xf32>
    %53 = arith.mulf %51, %52 : vector<16x256xf32>
    %54 = arith.truncf %53 : vector<16x256xf32> to vector<16x256xbf16>
    %c96 = arith.constant 96 : index
    %c0_13 = arith.constant 0 : index
    %55 = vector.load %arg8[%c96, %c0_13] : memref<288x256xbf16, #tpu.memory_space<vmem>>, vector<16x256xbf16>
    tpu.vector_store %arg8[%c96, %c0_13], %54 {strides = array<i32>} : memref<288x256xbf16, #tpu.memory_space<vmem>>, vector<16x256xbf16>,
    %c240_i32 = arith.constant 240 : i32
    %56 = tpu.dynamic_rotate %25 by %c240_i32 dim 1 : vector<16x256xf32>, i32 -> vector<16x256xf32>
    %57 = arith.truncf %56 : vector<16x256xf32> to vector<16x256xbf16>
    %c112 = arith.constant 112 : index
    %c0_14 = arith.constant 0 : index
    %58 = vector.load %arg8[%c112, %c0_14] : memref<288x256xbf16, #tpu.memory_space<vmem>>, vector<16x256xbf16>
    tpu.vector_store %arg8[%c112, %c0_14], %57 {strides = array<i32>} : memref<288x256xbf16, #tpu.memory_space<vmem>>, vector<16x256xbf16>,
    %c239_i32 = arith.constant 239 : i32
    %59 = tpu.dynamic_rotate %25 by %c239_i32 dim 1 : vector<16x256xf32>, i32 -> vector<16x256xf32>
    %60 = vector.broadcast %13 : vector<1x256xf32> to vector<16x256xf32>
    %61 = arith.mulf %59, %60 : vector<16x256xf32>
    %62 = arith.truncf %61 : vector<16x256xf32> to vector<16x256xbf16>
    %c128 = arith.constant 128 : index
    %c0_15 = arith.constant 0 : index
    %63 = vector.load %arg8[%c128, %c0_15] : memref<288x256xbf16, #tpu.memory_space<vmem>>, vector<16x256xbf16>
    tpu.vector_store %arg8[%c128, %c0_15], %62 {strides = array<i32>} : memref<288x256xbf16, #tpu.memory_space<vmem>>, vector<16x256xbf16>,
    %c0_16 = arith.constant 0 : index
    %c0_17 = arith.constant 0 : index
    %64 = vector.load %arg3[%c0_16, %c0_17] : memref<32x144xbf16, #tpu.memory_space<vmem>>, vector<32x144xbf16>
    %c0_18 = arith.constant 0 : index
    %c0_19 = arith.constant 0 : index
    %65 = vector.load %arg8[%c0_18, %c0_19] : memref<288x256xbf16, #tpu.memory_space<vmem>>, vector<144x256xbf16>
    %cst = arith.constant dense<0.000000e+00> : vector<32x256xf32>
    %66 = tpu.matmul %64, %65, %cst {dimension_numbers = #tpu.dot_dimension_numbers<[1], [0], [0], [1], [0, 0, 1, 1], [], []>} : vector<32x144xbf16>, vector<144x256xbf16>, vector<32x256xf32> -> vector<32x256xf32>
    %c0_20 = arith.constant 0 : index
    %c0_21 = arith.constant 0 : index
    %67 = vector.load %arg4[%c0_20, %c0_21] : memref<32x1xf32, #tpu.memory_space<vmem>>, vector<32x1xf32>
    %68 = vector.broadcast %67 : vector<32x1xf32> to vector<32x256xf32>
    %69 = arith.addf %66, %68 : vector<32x256xf32>
    %cst_22 = arith.constant 0.000000e+00 : f32
    %70 = vector.broadcast %cst_22 : f32 to vector<32x256xf32>
    %71 = arith.maximumf %69, %70 : vector<32x256xf32>
    %72 = vector.broadcast %23 : vector<1x256xf32> to vector<32x256xf32>
    %73 = arith.mulf %71, %72 : vector<32x256xf32>
    %c17_i32_23 = arith.constant 17 : i32
    %74 = tpu.dynamic_rotate %73 by %c17_i32_23 dim 1 : vector<32x256xf32>, i32 -> vector<32x256xf32>
    %75 = vector.broadcast %9 : vector<1x256xf32> to vector<32x256xf32>
    %76 = arith.mulf %74, %75 : vector<32x256xf32>
    %77 = arith.truncf %76 : vector<32x256xf32> to vector<32x256xbf16>
    %c0_24 = arith.constant 0 : index
    %c0_25 = arith.constant 0 : index
    %78 = vector.load %arg8[%c0_24, %c0_25] : memref<288x256xbf16, #tpu.memory_space<vmem>>, vector<32x256xbf16>
    tpu.vector_store %arg8[%c0_24, %c0_25], %77 {strides = array<i32>} : memref<288x256xbf16, #tpu.memory_space<vmem>>, vector<32x256xbf16>,
    %c16_i32_26 = arith.constant 16 : i32
    %79 = tpu.dynamic_rotate %73 by %c16_i32_26 dim 1 : vector<32x256xf32>, i32 -> vector<32x256xf32>
    %80 = arith.truncf %79 : vector<32x256xf32> to vector<32x256xbf16>
    %c32_27 = arith.constant 32 : index
    %c0_28 = arith.constant 0 : index
    %81 = vector.load %arg8[%c32_27, %c0_28] : memref<288x256xbf16, #tpu.memory_space<vmem>>, vector<32x256xbf16>
    tpu.vector_store %arg8[%c32_27, %c0_28], %80 {strides = array<i32>} : memref<288x256xbf16, #tpu.memory_space<vmem>>, vector<32x256xbf16>,
    %c15_i32_29 = arith.constant 15 : i32
    %82 = tpu.dynamic_rotate %73 by %c15_i32_29 dim 1 : vector<32x256xf32>, i32 -> vector<32x256xf32>
    %83 = vector.broadcast %13 : vector<1x256xf32> to vector<32x256xf32>
    %84 = arith.mulf %82, %83 : vector<32x256xf32>
    %85 = arith.truncf %84 : vector<32x256xf32> to vector<32x256xbf16>
    %c64_30 = arith.constant 64 : index
    %c0_31 = arith.constant 0 : index
    %86 = vector.load %arg8[%c64_30, %c0_31] : memref<288x256xbf16, #tpu.memory_space<vmem>>, vector<32x256xbf16>
    tpu.vector_store %arg8[%c64_30, %c0_31], %85 {strides = array<i32>} : memref<288x256xbf16, #tpu.memory_space<vmem>>, vector<32x256xbf16>,
    %c1_i32_32 = arith.constant 1 : i32
    %87 = tpu.dynamic_rotate %73 by %c1_i32_32 dim 1 : vector<32x256xf32>, i32 -> vector<32x256xf32>
    %88 = vector.broadcast %9 : vector<1x256xf32> to vector<32x256xf32>
    %89 = arith.mulf %87, %88 : vector<32x256xf32>
    %90 = arith.truncf %89 : vector<32x256xf32> to vector<32x256xbf16>
    %c96_33 = arith.constant 96 : index
    %c0_34 = arith.constant 0 : index
    %91 = vector.load %arg8[%c96_33, %c0_34] : memref<288x256xbf16, #tpu.memory_space<vmem>>, vector<32x256xbf16>
    tpu.vector_store %arg8[%c96_33, %c0_34], %90 {strides = array<i32>} : memref<288x256xbf16, #tpu.memory_space<vmem>>, vector<32x256xbf16>,
    %92 = arith.truncf %73 : vector<32x256xf32> to vector<32x256xbf16>
    %c128_35 = arith.constant 128 : index
    %c0_36 = arith.constant 0 : index
    %93 = vector.load %arg8[%c128_35, %c0_36] : memref<288x256xbf16, #tpu.memory_space<vmem>>, vector<32x256xbf16>
    tpu.vector_store %arg8[%c128_35, %c0_36], %92 {strides = array<i32>} : memref<288x256xbf16, #tpu.memory_space<vmem>>, vector<32x256xbf16>,
    %c255_i32_37 = arith.constant 255 : i32
    %94 = tpu.dynamic_rotate %73 by %c255_i32_37 dim 1 : vector<32x256xf32>, i32 -> vector<32x256xf32>
    %95 = vector.broadcast %13 : vector<1x256xf32> to vector<32x256xf32>
    %96 = arith.mulf %94, %95 : vector<32x256xf32>
    %97 = arith.truncf %96 : vector<32x256xf32> to vector<32x256xbf16>
    %c160 = arith.constant 160 : index
    %c0_38 = arith.constant 0 : index
    %98 = vector.load %arg8[%c160, %c0_38] : memref<288x256xbf16, #tpu.memory_space<vmem>>, vector<32x256xbf16>
    tpu.vector_store %arg8[%c160, %c0_38], %97 {strides = array<i32>} : memref<288x256xbf16, #tpu.memory_space<vmem>>, vector<32x256xbf16>,
    %c241_i32_39 = arith.constant 241 : i32
    %99 = tpu.dynamic_rotate %73 by %c241_i32_39 dim 1 : vector<32x256xf32>, i32 -> vector<32x256xf32>
    %100 = vector.broadcast %9 : vector<1x256xf32> to vector<32x256xf32>
    %101 = arith.mulf %99, %100 : vector<32x256xf32>
    %102 = arith.truncf %101 : vector<32x256xf32> to vector<32x256xbf16>
    %c192 = arith.constant 192 : index
    %c0_40 = arith.constant 0 : index
    %103 = vector.load %arg8[%c192, %c0_40] : memref<288x256xbf16, #tpu.memory_space<vmem>>, vector<32x256xbf16>
    tpu.vector_store %arg8[%c192, %c0_40], %102 {strides = array<i32>} : memref<288x256xbf16, #tpu.memory_space<vmem>>, vector<32x256xbf16>,
    %c240_i32_41 = arith.constant 240 : i32
    %104 = tpu.dynamic_rotate %73 by %c240_i32_41 dim 1 : vector<32x256xf32>, i32 -> vector<32x256xf32>
    %105 = arith.truncf %104 : vector<32x256xf32> to vector<32x256xbf16>
    %c224 = arith.constant 224 : index
    %c0_42 = arith.constant 0 : index
    %106 = vector.load %arg8[%c224, %c0_42] : memref<288x256xbf16, #tpu.memory_space<vmem>>, vector<32x256xbf16>
    tpu.vector_store %arg8[%c224, %c0_42], %105 {strides = array<i32>} : memref<288x256xbf16, #tpu.memory_space<vmem>>, vector<32x256xbf16>,
    %c239_i32_43 = arith.constant 239 : i32
    %107 = tpu.dynamic_rotate %73 by %c239_i32_43 dim 1 : vector<32x256xf32>, i32 -> vector<32x256xf32>
    %108 = vector.broadcast %13 : vector<1x256xf32> to vector<32x256xf32>
    %109 = arith.mulf %107, %108 : vector<32x256xf32>
    %110 = arith.truncf %109 : vector<32x256xf32> to vector<32x256xbf16>
    %c256 = arith.constant 256 : index
    %c0_44 = arith.constant 0 : index
    %111 = vector.load %arg8[%c256, %c0_44] : memref<288x256xbf16, #tpu.memory_space<vmem>>, vector<32x256xbf16>
    tpu.vector_store %arg8[%c256, %c0_44], %110 {strides = array<i32>} : memref<288x256xbf16, #tpu.memory_space<vmem>>, vector<32x256xbf16>,
    %c0_45 = arith.constant 0 : index
    %c0_46 = arith.constant 0 : index
    %112 = vector.load %arg5[%c0_45, %c0_46] : memref<8x288xbf16, #tpu.memory_space<vmem>>, vector<8x288xbf16>
    %c0_47 = arith.constant 0 : index
    %c0_48 = arith.constant 0 : index
    %113 = vector.load %arg8[%c0_47, %c0_48] : memref<288x256xbf16, #tpu.memory_space<vmem>>, vector<288x256xbf16>
    %cst_49 = arith.constant dense<0.000000e+00> : vector<8x256xf32>
    %114 = tpu.matmul %112, %113, %cst_49 {dimension_numbers = #tpu.dot_dimension_numbers<[1], [0], [0], [1], [0, 0, 1, 1], [], []>} : vector<8x288xbf16>, vector<288x256xbf16>, vector<8x256xf32> -> vector<8x256xf32>
    %c0_50 = arith.constant 0 : index
    %c0_51 = arith.constant 0 : index
    %115 = vector.load %arg6[%c0_50, %c0_51] : memref<8x1xf32, #tpu.memory_space<vmem>>, vector<8x1xf32>
    %116 = vector.broadcast %115 : vector<8x1xf32> to vector<8x256xf32>
    %117 = arith.addf %114, %116 : vector<8x256xf32>
    %118 = math.tanh %117 : vector<8x256xf32>
    %119 = vector.extract_strided_slice %118 {offsets = [0, 32], sizes = [8, 128], strides = [1, 1]} : vector<8x256xf32> to vector<8x128xf32>
    %c0_52 = arith.constant 0 : index
    %c0_53 = arith.constant 0 : index
    %c0_54 = arith.constant 0 : index
    %120 = vector.load %arg7[%c0_52, %c0_53, %c0_54] : memref<1x8x128xf32, #tpu.memory_space<vmem>>, vector<1x8x128xf32>
    %121 = vector.shape_cast %120 : vector<1x8x128xf32> to vector<8x128xf32>
    %122 = vector.shape_cast %119 : vector<8x128xf32> to vector<1x8x128xf32>
    tpu.vector_store %arg7[%c0_52, %c0_53, %c0_54], %122 {strides = array<i32>} : memref<1x8x128xf32, #tpu.memory_space<vmem>>, vector<1x8x128xf32>,
    return
  }
  func.func @transform_0(%arg0: i32, %arg1: i32) -> (i32, i32, i32, i32) {
    %c0_i32 = arith.constant 0 : i32
    %c0_i32_0 = arith.constant 0 : i32
    %c0_i32_1 = arith.constant 0 : i32
    return %arg0, %arg1, %c0_i32, %c0_i32_0 : i32, i32, i32, i32
  }
  func.func @transform_1(%arg0: i32, %arg1: i32) -> (i32, i32) {
    %c0_i32 = arith.constant 0 : i32
    %c0_i32_0 = arith.constant 0 : i32
    %c0_i32_1 = arith.constant 0 : i32
    return %c0_i32, %c0_i32_0 : i32, i32
  }
  func.func @transform_2(%arg0: i32, %arg1: i32) -> (i32, i32) {
    %c0_i32 = arith.constant 0 : i32
    %c0_i32_0 = arith.constant 0 : i32
    %c0_i32_1 = arith.constant 0 : i32
    return %c0_i32, %c0_i32_0 : i32, i32
  }
  func.func @transform_3(%arg0: i32, %arg1: i32) -> (i32, i32) {
    %c0_i32 = arith.constant 0 : i32
    %c0_i32_0 = arith.constant 0 : i32
    %c0_i32_1 = arith.constant 0 : i32
    return %c0_i32, %c0_i32_0 : i32, i32
  }
  func.func @transform_4(%arg0: i32, %arg1: i32) -> (i32, i32) {
    %c0_i32 = arith.constant 0 : i32
    %c0_i32_0 = arith.constant 0 : i32
    %c0_i32_1 = arith.constant 0 : i32
    return %c0_i32, %c0_i32_0 : i32, i32
  }
  func.func @transform_5(%arg0: i32, %arg1: i32) -> (i32, i32, i32) {
    %c0_i32 = arith.constant 0 : i32
    %c0_i32_0 = arith.constant 0 : i32
    return %arg0, %c0_i32, %arg1 : i32, i32, i32
  }
}

</mosaic_0001>

<bundles_post_ra>
// kernel: transposenet_forward.1
= control target key start
LH: loop header
LB: loop body
LE: loop exit
PB: predicated region body
PF: predicated region fallthrough
CT: control target
= control target key end

     0   :  { %s1959_s18 = smov 0   ;;  %s1961_s19 = smov 0   ;;  %s2597_s0 = inlined_call_operand.vmem [shape: f32[2,2,16,256], index: 0, kind: input, shape index: {}]   ;;  %s2598_s1 = inlined_call_operand.vmem [shape: bf16[32,144], index: 1, kind: input, shape index: {}]   ;;  %s2599_s2 = inlined_call_operand.vmem [shape: f32[32,1], index: 2, kind: input, shape index: {}]   ;;  %s2600_s3 = inlined_call_operand.vmem [shape: bf16[8,288], index: 3, kind: input, shape index: {}]   ;;  %s2601_s4 = inlined_call_operand.vmem [shape: f32[8,1], index: 4, kind: input, shape index: {}]   ;;  %s2602_s5 = inlined_call_operand.vmem [shape: f32[2,8,256], index: 5, kind: output, shape index: {}]  }
   0x1   :  { %s1963_s20 = smov 0   ;;  %s1965_s21 = smov 0  }
   0x2   :  { %s1967_s22 = smov 0  }
   0x3 LB: > { %s24_s23 = sadd.s32 1, %s1908_s20  ;;  %s27_s24 = sadd.s32 1, %s1912_s21  ;;  %s1916_s22 = sphi %s1967_s22, %s15_s22   ;;  %s1912_s21 = sphi %s1965_s21, %s2609_s21   ;;  %s1908_s20 = sphi %s1963_s20, %s2608_s20   ;;  %s1904_s19 = sphi %s1961_s19, %s2607_s19   ;;  %s1900_s18 = sphi %s1959_s18, %s2606_s18  }
   0x4   : > { %p25_p0 = scmp.ge.s32.totalorder %s24_s23, 2  ;;  %p1448_p1 = scmp.ge.s32.totalorder %s1916_s22, 1 }
   0x5   : > { %p207_p2 = scmp.lt.s32.totalorder %s1916_s22, 5 }
   0x6   : > { %s2611_s23 = smov (%p25_p0, %s24_s23), 0  ;;  %s2613_s24 = smov (!%p25_p0, %s27_s24), %s1912_s21 }
   0x7   : > { %p208_p3 = pnand %p1448_p1, %p207_p2  ;;  %p29_p4 = scmp.ge.s32.totalorder %s2613_s24, 2 }
   0x8   : > { %p242_p5 = scmp.lt.s32.totalorder (!%p208_p3), %s1904_s19, 1  ;;  %p244_p6 = scmp.lt.s32.totalorder (!%p208_p3), %s1900_s18, 1 }
   0x9   : > { %s2615_s24 = smov (%p29_p4, %s2613_s24), 0  ;;  %211 = sbr.rel (%p208_p3) target bundleno = 896 (0x380), region = 40 }
   0xa   : > { %s1918_s8 = smov (!%p208_p3), 113   ;;  %s1919_s9 = smov (!%p208_p3), 112  }
   0xb   : > { %s1920_s10 = smov (!%p208_p3), 127   ;;  %s1921_s11 = smov (!%p208_p3), 1  }
   0xc   : > { %s1922_s12 = smov (!%p208_p3), 15   ;;  %s1923_s13 = smov (!%p208_p3), 16  }
   0xd   : > { %s1924_s14 = smov (!%p208_p3), 17   ;;  %s2603_s15 = smov (!%p208_p3), 111  }
   0xe   : > { %s2617_s19 = smov (!%p242_p5, %s1904_s19), 1  ;;  %v261_v6 = vlaneseq  ;;  %v1926_v13 = vmov 0.0   ;;  %vm616_vm12 = vcmask 130048  }
   0xf   : > { %s1995_s25 = scalar_select %p244_p6, %s1900_s18, 1 }
  0x10   : > { %s1450_s26 = sshll.u32 %s2617_s19, 3  ;;  %v2057_v8 = vand.u32 127, %v261_v6  ;;  %s1452_s30 = sshll.u32 %s2617_s19, 1 }
  0x11   : > { %s1449_s27 = sshll.u32 %s1995_s25, 2  ;;  %s256_s6 = sadd.s32 %s1452_s30, %s1995_s25 }
  0x12   : > { %s248_s28 = sadd.s32 %s1450_s26, %s1449_s27  ;;  %v2060_v9 = vadd.s32 128, %v2057_v8  ;;  %v264_v10 = vand.u32 15, %v2057_v8  ;;  %vm411_vm2 = vcmp.lt.s32.totalorder %v2057_v8, 113  ;;  %vm432_vm3 = vcmp.lt.s32.totalorder %v2057_v8, 112 }
  0x13   : > { %s1451_s29 = sshll.u32 %s248_s28, 3  ;;  %vm390_vm6 = vcmp.lt.s32.totalorder %v2057_v8, 127  ;;  %vm365_vm7 = vcmp.lt.s32.totalorder %v2057_v8, 1  ;;  %vm344_vm8 = vcmp.lt.s32.totalorder %v2057_v8, 15  ;;  %vm327_vm9 = vcmp.lt.s32.totalorder %v2057_v8, 16  ;;  %s1454_s28 = sshll.u32 %s1900_s18, 3 }
  0x14   : > { %s250_s7 = scalar_lea.vmem %s2597_s0, %s1451_s29  ;;  %v265_v11 = vand.u32 15, %v2060_v9  ;;  %vm268_vm0 = vcmp.ge.s32.totalorder %v264_v10, 1  ;;  %vm274_vm4 = vcmp.le.s32.totalorder %v264_v10, 14  ;;  %vm306_vm10 = vcmp.lt.s32.totalorder %v2057_v8, 17  ;;  %s1459_s29 = sadd.s32 4294967294, %s1454_s28 }
  0x15   : > { %v2002_v0 = vld [vmem:[%s250_s7] sm:$0xff]  ;;  %v2004_v1 = vld [vmem:[%s250_s7 + $0x10] sm:$0xff]  ;;  %v2006_v2 = vld [vmem:[%s250_s7 + $0x8] sm:$0xff]  ;;  %v2066_v14 = vsel %vm268_vm0, 1.0, %v1926_v13  ;;  %v2097_v45 = vsel %vm274_vm4, 1.0, %v1926_v13  ;;  %vm449_vm11 = vcmp.lt.s32.totalorder %v2057_v8, 111 }
  0x16   : > { %403 = vrot.lane.b32.xlu1 %v2002_v0, %s1918_s8  ;;  %v1811_v3 = vpack.i.bf16 %v2004_v1, %v2002_v0  ;;  %407 = vrot.lane.b32.xlu2 %v2006_v2, %s1918_s8  ;;  %v297_v4 = vld [vmem:[%s250_s7 + $0x18] sm:$0xff]  ;;  %vm269_vm1 = vcmp.ge.s32.totalorder %v265_v11, 1  ;;  %v378_v22 = vpack.c.bf16 %v2006_v2, %v2002_v0  ;;  %vm275_vm5 = vcmp.le.s32.totalorder %v265_v11, 14  ;;  %s2605_s18 = smov 111   ;;  %s1453_s7 = sshll.u32 %s256_s6, 3 }
  0x17   : > { %v1816_v5 = vpack.i.bf16 %v297_v4, %v2006_v2  ;;  %v2069_v15 = vsel %vm269_vm1, 1.0, %v1926_v13  ;;  %v379_v23 = vpack.c.bf16 %v297_v4, %v2004_v1  ;;  %v2100_v46 = vsel %vm275_vm5, 1.0, %v1926_v13  ;;  %s258_s26 = scalar_lea.vmem %s2602_s5, %s1453_s7 }
  0x18   : > { %1812 = vrot.lane.b32.xlu0 %v1811_v3, %s1919_s9  ;;  %380 = vst [vmem:[#allocation2 + $0x40] sm:$0xff] %v378_v22 }
  0x19   : > { %381 = vst [vmem:[#allocation2 + $0x48] sm:$0xff] %v379_v23 }
  0x1e   : > { %405 = vrot.lane.b32.xlu1 %v2004_v1, %s1918_s8  ;;  %409 = vrot.lane.b32.xlu2 %v297_v4, %s1918_s8 }
  0x20   : > { %1817 = vrot.lane.b32.xlu0 %v1816_v5, %s1919_s9 }
  0x26   : > { %384 = vrot.lane.b32.xlu1 %v2004_v1, %s1920_s10  ;;  %386 = vrot.lane.b32.xlu2 %v2006_v2, %s1920_s10 }
  0x28   : > { %382 = vrot.lane.b32.xlu0 %v2002_v0, %s1920_s10 }
  0x2e   : > { %357 = vrot.lane.b32.xlu1 %v2002_v0, %s1921_s11  ;;  %359 = vrot.lane.b32.xlu2 %v2004_v1, %s1921_s11 }
  0x30   : > { %388 = vrot.lane.b32.xlu0 %v297_v4, %s1920_s10 }
  0x36   : > { %363 = vrot.lane.b32.xlu1 %v297_v4, %s1921_s11  ;;  %336 = vrot.lane.b32.xlu2 %v2002_v0, %s1922_s12 }
  0x38   : > { %361 = vrot.lane.b32.xlu0 %v2006_v2, %s1921_s11 }
  0x3e   : > { %340 = vrot.lane.b32.xlu1 %v2006_v2, %s1922_s12  ;;  %342 = vrot.lane.b32.xlu2 %v297_v4, %s1922_s12 }
  0x40   : > { %338 = vrot.lane.b32.xlu0 %v2004_v1, %s1922_s12 }
  0x46   : > { %1827 = vrot.lane.b32.xlu1 %v1816_v5, %s1923_s13  ;;  %298 = vrot.lane.b32.xlu2 %v2002_v0, %s1924_s14 }
  0x48   : > { %1822 = vrot.lane.b32.xlu0 %v1811_v3, %s1923_s13 }
  0x4e   : > { %302 = vrot.lane.b32.xlu1 %v2006_v2, %s1924_s14  ;;  %304 = vrot.lane.b32.xlu2 %v297_v4, %s1924_s14 }
  0x50   : > { %300 = vrot.lane.b32.xlu0 %v2004_v1, %s1924_s14 }
  0x56   : > { %443 = vrot.lane.b32.xlu1 %v2004_v1, %s2603_s15  ;;  %445 = vrot.lane.b32.xlu2 %v2006_v2, %s2603_s15 }
  0x58   : > { %441 = vrot.lane.b32.xlu0 %v2002_v0, %s2603_s15 }
  0x60   : > { %447 = vrot.lane.b32.xlu0 %v297_v4, %s2603_s15 }
  0x70   : > { %v408_v7 = vpop.permute.xlu2 %407 }
  0x78   : > { %v410_v12 = vpop.permute.xlu2 %409 }
  0x80   : > { %v387_v25 = vpop.permute.xlu2 %386 }
  0x88   : > { %v404_v16 = vpop.permute.xlu1 %403  ;;  %v360_v43 = vpop.permute.xlu2 %359 }
  0x89   : > { %v412_v17 = vsel %vm411_vm2, %v404_v16, %v408_v7  ;;  %v414_v18 = vsel %vm411_vm2, %v408_v7, %v404_v16 }
  0x8a   : > { %v416_v19 = vmul.f32 %v2066_v14, %v412_v17  ;;  %v417_v20 = vmul.f32 %v2069_v15, %v414_v18  ;;  %v1813_v21 = vpop.permute.xlu0 %1812 }
  0x8b   : > { %v1815_v32 = vunpack.i.h.bf16 %v1813_v21  ;;  %v1814_v33 = vunpack.i.l.bf16 %v1813_v21 }
  0x8c   : > { %v420_v24 = vpack.c.bf16 %v417_v20, %v416_v19 }
  0x8e   : > { %422 = vst [vmem:[#allocation2 + $0x60] sm:$0xff] %v420_v24 }
  0x90   : > { %v406_v26 = vpop.permute.xlu1 %405  ;;  %v337_v58 = vpop.permute.xlu2 %336 }
  0x91   : > { %v413_v27 = vsel %vm411_vm2, %v406_v26, %v410_v12  ;;  %v415_v28 = vsel %vm411_vm2, %v410_v12, %v406_v26  ;;  %v1512_v26 = vld [vmem:[#allocation2 + $0x40] sm:$0xf] }
  0x92   : > { %v418_v29 = vmul.f32 %v2066_v14, %v413_v27  ;;  %v419_v30 = vmul.f32 %v2069_v15, %v415_v28  ;;  %v1818_v31 = vpop.permute.xlu0 %1817  ;;  %v1715_v27 = vld [vmem:[#allocation2 + $0x44] sm:$0xf0]  ;;  %v1714_v28 = vld [vmem:[#allocation2 + $0x44] sm:$0xf] }
  0x93   : > { %v1820_v34 = vunpack.i.h.bf16 %v1818_v31  ;;  %v1819_v35 = vunpack.i.l.bf16 %v1818_v31  ;;  %v1514_v31 = vld [vmem:[#allocation2 + $0x48] sm:$0xf0] }
  0x94   : > { %v421_v36 = vpack.c.bf16 %v419_v30, %v418_v29 }
  0x95   : > { %v433_v37 = vsel %vm432_vm3, %v1814_v33, %v1819_v35  ;;  %v434_v38 = vsel %vm432_vm3, %v1815_v32, %v1820_v34  ;;  %v435_v39 = vsel %vm432_vm3, %v1819_v35, %v1814_v33  ;;  %v436_v40 = vsel %vm432_vm3, %v1820_v34, %v1815_v32  ;;  %v1528_v61 = vld [vmem:[#allocation2 + $0x60] sm:$0xf]  ;;  %v1718_v0 = vld [vmem:[#allocation2 + $0x64] sm:$0xf] }
  0x96   : > { %423 = vst [vmem:[#allocation2 + $0x68] sm:$0xff] %v421_v36  ;;  %v437_v41 = vpack.c.bf16 %v435_v39, %v433_v37  ;;  %v438_v42 = vpack.c.bf16 %v436_v40, %v434_v38  ;;  %v1513_v40 = vor.u32 %v1715_v27, %v1512_v26 }
  0x98   : > { %439 = vst [vmem:[#allocation2 + $0x70] sm:$0xff] %v437_v41  ;;  %v385_v44 = vpop.permute.xlu1 %384  ;;  %v343_v20 = vpop.permute.xlu2 %342 }
  0x99   : > { %440 = vst [vmem:[#allocation2 + $0x78] sm:$0xff] %v438_v42 }
  0x9a   : > { %v383_v47 = vpop.permute.xlu0 %382 }
  0x9b   : > { %v391_v48 = vsel %vm390_vm6, %v383_v47, %v387_v25  ;;  %v393_v49 = vsel %vm390_vm6, %v387_v25, %v383_v47 }
  0x9c   : > { %v395_v50 = vmul.f32 %v2097_v45, %v391_v48  ;;  %v396_v51 = vmul.f32 %v2100_v46, %v393_v49 }
  0x9d   : > { %v1719_v63 = vld [vmem:[#allocation2 + $0x64] sm:$0xf0]  ;;  %v1530_v1 = vld [vmem:[#allocation2 + $0x68] sm:$0xf0] }
  0x9e   : > { %v399_v52 = vpack.c.bf16 %v396_v51, %v395_v50  ;;  %v1529_v6 = vor.u32 %v1719_v63, %v1528_v61  ;;  %v1533_v7 = vor.u32 %v1718_v0, %v1530_v1 }
  0x9f   : > { %v1536_v53 = vld [vmem:[#allocation2 + $0x70] sm:$0xf]  ;;  %v1720_v54 = vld [vmem:[#allocation2 + $0x74] sm:$0xf] }
  0xa0   : > { %401 = vst [vmem:[#allocation2 + $0x50] sm:$0xff] %v399_v52  ;;  %v358_v55 = vpop.permute.xlu1 %357  ;;  %v1721_v56 = vld [vmem:[#allocation2 + $0x74] sm:$0xf0]  ;;  %v1538_v57 = vld [vmem:[#allocation2 + $0x78] sm:$0xf0]  ;;  %v299_v52 = vpop.permute.xlu2 %298 }
  0xa1   : > { %v1537_v59 = vor.u32 %v1721_v56, %v1536_v53  ;;  %v1541_v60 = vor.u32 %v1720_v54, %v1538_v57 }
  0xa2   : > { %v389_v62 = vpop.permute.xlu0 %388 }
  0xa3   : > { %v392_v2 = vsel %vm390_vm6, %v385_v44, %v389_v62  ;;  %v394_v3 = vsel %vm390_vm6, %v389_v62, %v385_v44  ;;  %623 = vmatpush.bf16.msra.mxu0 %v1537_v59  ;;  %661 = vmatpush.bf16.msra.mxu2 %v1541_v60  ;;  %v1517_v44 = vor.u32 %v1714_v28, %v1514_v31  ;;  %v1927_v28 = vmov 0  }
  0xa4   : > { %v397_v4 = vmul.f32 %v2097_v45, %v392_v2  ;;  %v398_v5 = vmul.f32 %v2100_v46, %v394_v3  ;;  %1831 = vset.pattern.permute.xlu1 %v1927_v28  ;;  %1833 = vset.pattern.permute.xlu0 %v1927_v28 }
  0xa5   : > { %1832 = vset.pattern.permute.xlu2 %v1927_v28 }
  0xa6   : > { %v400_v10 = vpack.c.bf16 %v398_v5, %v397_v4 }
  0xa7   : > { %624 = vmatpush.bf16.msra.mxu0 %v1529_v6  ;;  %662 = vmatpush.bf16.msra.mxu2 %v1533_v7  ;;  %v1520_v30 = vld [vmem:[#allocation2 + $0x50] sm:$0xf]  ;;  %v1716_v33 = vld [vmem:[#allocation2 + $0x54] sm:$0xf] }
  0xa8   : > { %402 = vst [vmem:[#allocation2 + $0x58] sm:$0xff] %v400_v10  ;;  %v364_v11 = vpop.permute.xlu1 %363 }
  0xa9   : > { %v367_v12 = vsel %vm365_vm7, %v360_v43, %v364_v11  ;;  %v369_v16 = vsel %vm365_vm7, %v364_v11, %v360_v43 }
  0xaa   : > { %v372_v17 = vmul.f32 %v2066_v14, %v369_v16  ;;  %v373_v18 = vmul.f32 %v2069_v15, %v367_v12  ;;  %v362_v19 = vpop.permute.xlu0 %361  ;;  %v305_v12 = vpop.permute.xlu2 %304 }
  0xab   : > { %v366_v21 = vsel %vm365_vm7, %v358_v55, %v362_v19  ;;  %v368_v22 = vsel %vm365_vm7, %v362_v19, %v358_v55 }
  0xac   : > { %v375_v23 = vpack.c.bf16 %v373_v18, %v372_v17  ;;  %v370_v24 = vmul.f32 %v2066_v14, %v368_v22  ;;  %v371_v25 = vmul.f32 %v2069_v15, %v366_v21 }
  0xae   : > { %377 = vst [vmem:[#allocation2 + $0x38] sm:$0xff] %v375_v23  ;;  %v374_v29 = vpack.c.bf16 %v371_v25, %v370_v24 }
  0xaf   : > { %v1717_v32 = vld [vmem:[#allocation2 + $0x54] sm:$0xf0]  ;;  %v1522_v34 = vld [vmem:[#allocation2 + $0x58] sm:$0xf0] }
  0xb0   : > { %376 = vst [vmem:[#allocation2 + $0x30] sm:$0xff] %v374_v29  ;;  %v341_v35 = vpop.permute.xlu1 %340  ;;  %v1521_v36 = vor.u32 %v1717_v32, %v1520_v30  ;;  %v1525_v37 = vor.u32 %v1716_v33, %v1522_v34  ;;  %v486_v32 = vld [vmem:[%s2599_s2 + $0x10] sm:$0xff]  ;;  %v484_v34 = vld [vmem:[%s2599_s2] sm:$0xff] }
  0xb1   : > { %v345_v38 = vsel %vm344_vm8, %v337_v58, %v341_v35  ;;  %v347_v39 = vsel %vm344_vm8, %v341_v35, %v337_v58  ;;  %500 = vperm.xlu1 %1831, %v486_v32   ;;  %490 = vperm.xlu0 %1833, %v484_v34  }
  0xb2   : > { %v349_v41 = vmul.f32 %v2097_v45, %v347_v39  ;;  %v350_v42 = vmul.f32 %v2100_v46, %v345_v38  ;;  %v339_v43 = vpop.permute.xlu0 %338  ;;  %625 = vmatpush.bf16.msra.mxu0 %v1521_v36  ;;  %663 = vmatpush.bf16.msra.mxu2 %v1525_v37  ;;  %v446_v37 = vpop.permute.xlu2 %445 }
  0xb3   : > { %v346_v47 = vsel %vm344_vm8, %v339_v43, %v343_v20  ;;  %v348_v48 = vsel %vm344_vm8, %v343_v20, %v339_v43 }
  0xb4   : > { %v353_v49 = vpack.c.bf16 %v350_v42, %v349_v41  ;;  %v351_v50 = vmul.f32 %v2097_v45, %v348_v48  ;;  %v352_v51 = vmul.f32 %v2100_v46, %v346_v47  ;;  %v485_v47 = vld [vmem:[%s2599_s2 + $0x8] sm:$0xff] }
  0xb5   : > { %v1713_v53 = vld [vmem:[#allocation2 + $0x34] sm:$0xf0]  ;;  %v1506_v54 = vld [vmem:[#allocation2 + $0x38] sm:$0xf0] }
  0xb6   : > { %355 = vst [vmem:[#allocation2 + $0x20] sm:$0xff] %v353_v49  ;;  %v354_v55 = vpack.c.bf16 %v352_v51, %v351_v50  ;;  %626 = vmatpush.bf16.msra.mxu0 %v1513_v40  ;;  %664 = vmatpush.bf16.msra.mxu2 %v1517_v44 }
  0xb7   : > { %v1504_v56 = vld [vmem:[#allocation2 + $0x30] sm:$0xf]  ;;  %v1712_v57 = vld [vmem:[#allocation2 + $0x34] sm:$0xf] }
  0xb8   : > { %356 = vst [vmem:[#allocation2 + $0x28] sm:$0xff] %v354_v55  ;;  %v1828_v58 = vpop.permute.xlu1 %1827  ;;  %v1505_v59 = vor.u32 %v1713_v53, %v1504_v56  ;;  %v1509_v60 = vor.u32 %v1712_v57, %v1506_v54  ;;  %v1464_v53 = vld [vmem:[%s2598_s1] sm:$0xf]  ;;  %v1703_v54 = vld [vmem:[%s2598_s1 + $0x4] sm:$0xf0] }
  0xb9   : > { %v1830_v61 = vunpack.i.h.bf16 %v1828_v58  ;;  %v1829_v62 = vunpack.i.l.bf16 %v1828_v58  ;;  %495 = vperm.xlu1 %1831, %v485_v47  }
  0xba   : > { %v1823_v63 = vpop.permute.xlu0 %1822  ;;  %627 = vmatpush.bf16.msra.mxu0 %v1505_v59  ;;  %665 = vmatpush.bf16.msra.mxu2 %v1509_v60  ;;  %v1465_v60 = vor.u32 %v1703_v54, %v1464_v53 }
  0xbb   : > { %v1825_v0 = vunpack.i.h.bf16 %v1823_v63  ;;  %v1824_v1 = vunpack.i.l.bf16 %v1823_v63 }
  0xbd   : > { %v329_v2 = vsel %vm327_vm9, %v1825_v0, %v1830_v61  ;;  %v331_v3 = vsel %vm327_vm9, %v1830_v61, %v1825_v0  ;;  %v328_v4 = vsel %vm327_vm9, %v1824_v1, %v1829_v62  ;;  %v330_v5 = vsel %vm327_vm9, %v1829_v62, %v1824_v1  ;;  %v1496_v6 = vld [vmem:[#allocation2 + $0x20] sm:$0xf]  ;;  %v1710_v7 = vld [vmem:[#allocation2 + $0x24] sm:$0xf] }
  0xbe   : > { %v333_v10 = vpack.c.bf16 %v329_v2, %v331_v3  ;;  %v332_v11 = vpack.c.bf16 %v328_v4, %v330_v5  ;;  %v487_v2 = vld [vmem:[%s2599_s2 + $0x18] sm:$0xff]  ;;  %v1702_v4 = vld [vmem:[%s2598_s1 + $0x4] sm:$0xf]  ;;  %v1466_v5 = vld [vmem:[%s2598_s1 + $0x8] sm:$0xf0] }
  0xbf   : > { %v1711_v16 = vld [vmem:[#allocation2 + $0x24] sm:$0xf0]  ;;  %v1498_v17 = vld [vmem:[#allocation2 + $0x28] sm:$0xf0]  ;;  %505 = vperm.xlu2 %1832, %v487_v2  }
  0xc0   : > { %335 = vst [vmem:[#allocation2 + $0x18] sm:$0xff] %v333_v10  ;;  %v303_v18 = vpop.permute.xlu1 %302  ;;  %v1497_v19 = vor.u32 %v1711_v16, %v1496_v6  ;;  %v1501_v20 = vor.u32 %v1710_v7, %v1498_v17  ;;  %v1472_v7 = vld [vmem:[%s2598_s1 + $0x10] sm:$0xf]  ;;  %v1705_v10 = vld [vmem:[%s2598_s1 + $0x14] sm:$0xf0] }
  0xc1   : > { %334 = vst [vmem:[#allocation2 + $0x10] sm:$0xff] %v332_v11  ;;  %v307_v21 = vsel %vm306_vm10, %v299_v52, %v303_v18  ;;  %v309_v22 = vsel %vm306_vm10, %v303_v18, %v299_v52 }
  0xc2   : > { %v311_v23 = vmul.f32 %v2066_v14, %v309_v22  ;;  %v312_v24 = vmul.f32 %v2069_v15, %v307_v21  ;;  %v301_v25 = vpop.permute.xlu0 %300  ;;  %628 = vmatpush.bf16.msra.mxu0 %v1497_v19  ;;  %666 = vmatpush.bf16.msra.mxu2 %v1501_v20  ;;  %v1469_v19 = vor.u32 %v1702_v4, %v1466_v5  ;;  %v1704_v21 = vld [vmem:[%s2598_s1 + $0x14] sm:$0xf]  ;;  %v1474_v22 = vld [vmem:[%s2598_s1 + $0x18] sm:$0xf0] }
  0xc3   : > { %v308_v26 = vsel %vm306_vm10, %v301_v25, %v305_v12  ;;  %v310_v27 = vsel %vm306_vm10, %v305_v12, %v301_v25  ;;  %v1473_v20 = vor.u32 %v1705_v10, %v1472_v7  ;;  %v281_v25 = vstv %s1459_s29 }
  0xc4   : > { %v315_v29 = vpack.c.bf16 %v312_v24, %v311_v23  ;;  %v313_v30 = vmul.f32 %v2066_v14, %v310_v27  ;;  %v314_v31 = vmul.f32 %v2069_v15, %v308_v26  ;;  %v1477_v23 = vor.u32 %v1704_v21, %v1474_v22 }
  0xc5   : > { %v266_v24 = vshra.s32 %v2057_v8, 4  ;;  %v1028_v8 = vld [vmem:[%s2600_s3 + $0x8] sm:$0xf] }
  0xc6   : > { %317 = vst [vmem:[#allocation2] sm:$0xff] %v315_v29  ;;  %v316_v33 = vpack.c.bf16 %v314_v31, %v313_v30  ;;  %v267_v29 = vshra.s32 %v2060_v9, 4 }
  0xc7   : > { %v1709_v35 = vld [vmem:[#allocation2 + $0x14] sm:$0xf0]  ;;  %v1490_v36 = vld [vmem:[#allocation2 + $0x18] sm:$0xf0]  ;;  %v282_v27 = vadd.s32 %v281_v25, %v266_v24 }
  0xc8   : > { %318 = vst [vmem:[#allocation2 + $0x8] sm:$0xff] %v316_v33  ;;  %v1488_v38 = vld [vmem:[#allocation2 + $0x10] sm:$0xf]  ;;  %v1708_v39 = vld [vmem:[#allocation2 + $0x14] sm:$0xf]  ;;  %v444_v57 = vpop.permute.xlu1 %443  ;;  %v283_v33 = vadd.s32 %v281_v25, %v267_v29 }
  0xc9   : > { %v1489_v40 = vor.u32 %v1709_v35, %v1488_v38  ;;  %v1493_v41 = vor.u32 %v1708_v39, %v1490_v36  ;;  %vm284_vm13 = vcmp.ge.s32.totalorder %v282_v27, 0  ;;  %vm286_vm14 = vcmp.lt.s32.totalorder %v282_v27, 16 }
  0xca   : > { %v442_v42 = vpop.permute.xlu0 %441  ;;  %vm288_vm15 = vmand %vm284_vm13, %vm286_vm14  ;;  %vm285_vm0 = vcmp.ge.s32.totalorder %v283_v33, 0  ;;  %vm287_vm1 = vcmp.lt.s32.totalorder %v283_v33, 16 }
  0xcb   : > { %v450_v43 = vsel %vm449_vm11, %v442_v42, %v446_v37  ;;  %v452_v44 = vsel %vm449_vm11, %v446_v37, %v442_v42  ;;  %629 = vmatpush.bf16.msra.mxu0 %v1489_v40  ;;  %667 = vmatpush.bf16.msra.mxu2 %v1493_v41  ;;  %v2215_v37 = vsel %vm288_vm15, 1.0, %v1926_v13  ;;  %vm289_vm4 = vmand %vm285_vm0, %vm287_vm1 }
  0xcc   : > { %v454_v48 = vmul.f32 %v2097_v45, %v450_v43  ;;  %v455_v49 = vmul.f32 %v2100_v46, %v452_v44  ;;  %v1461_v44 = vsel %vm289_vm4, 1.0, %v1926_v13 }
  0xcd   : > { %v1480_v50 = vld [vmem:[#allocation2] sm:$0xf]  ;;  %v1706_v51 = vld [vmem:[#allocation2 + $0x4] sm:$0xf] }
  0xce   : > { %v458_v52 = vpack.c.bf16 %v455_v49, %v454_v48 }
  0xcf   : > { %v1707_v55 = vld [vmem:[#allocation2 + $0x4] sm:$0xf0]  ;;  %v1482_v56 = vld [vmem:[#allocation2 + $0x8] sm:$0xf0] }
  0xd0   : > { %460 = vst [vmem:[#allocation2 + $0x80] sm:$0xff] %v458_v52  ;;  %v1481_v58 = vor.u32 %v1707_v55, %v1480_v50  ;;  %v1485_v59 = vor.u32 %v1706_v51, %v1482_v56 }
  0xd2   : > { %v448_v61 = vpop.permute.xlu0 %447  ;;  %630 = vmatpush.bf16.msra.mxu0 %v1481_v58  ;;  %668 = vmatpush.bf16.msra.mxu2 %v1485_v59 }
  0xd3   : > { %v451_v62 = vsel %vm449_vm11, %v444_v57, %v448_v61  ;;  %v453_v63 = vsel %vm449_vm11, %v448_v61, %v444_v57 }
  0xd4   : > { %v456_v0 = vmul.f32 %v2097_v45, %v451_v62  ;;  %v457_v1 = vmul.f32 %v2100_v46, %v453_v63 }
  0xd5   : > { %631 = vmatmul.bf16.vlgmr.msra.gmra.mxu0 %v1465_v60  ;;  %669 = vmatmul.bf16.vlgmr.msra.gmra.mxu2 %v1465_v60 }
  0xd6   : > { %v459_v3 = vpack.c.bf16 %v457_v1, %v456_v0 }
  0xd7   : > { %v1544_v6 = vld [vmem:[#allocation2 + $0x80] sm:$0xf]  ;;  %v1722_v12 = vld [vmem:[#allocation2 + $0x84] sm:$0xf] }
  0xd8   : > { %461 = vst [vmem:[#allocation2 + $0x88] sm:$0xff] %v459_v3 }
  0xdf   : > { %v1723_v11 = vld [vmem:[#allocation2 + $0x84] sm:$0xf0]  ;;  %v1546_v16 = vld [vmem:[#allocation2 + $0x88] sm:$0xf0] }
  0xe0   : > { %v1545_v17 = vor.u32 %v1723_v11, %v1544_v6  ;;  %v1549_v18 = vor.u32 %v1722_v12, %v1546_v16 }
  0xe2   : > { %649 = vmatpush.bf16.msra.mxu1 %v1545_v17  ;;  %687 = vmatpush.bf16.msra.mxu3 %v1549_v18 }
  0xe5   : > { %1550 = vmatmul.msk.bf16.vlgmr.msra.gmra.mxu1 %vm616_vm12, %v1469_v19  ;;  %1552 = vmatmul.msk.bf16.vlgmr.msra.gmra.mxu3 %vm616_vm12, %v1469_v19 }
  0xe6   : > { %674 = vmatmul.bf16.gmra.mxu2 %v1473_v20  ;;  %636 = vmatmul.bf16.gmra.mxu0 %v1473_v20 }
  0xf5   : > { %1551 = vmatmul.msk.bf16.gmra.mxu1 %vm616_vm12, %v1477_v23  ;;  %1553 = vmatmul.msk.bf16.gmra.mxu3 %vm616_vm12, %v1477_v23 }
 0x119   : > { %v506_v0 = vpop.permute.xlu2 %505 }
 0x123   : > { %v491_v28 = vpop.permute.xlu0 %490  ;;  %v501_v30 = vpop.permute.xlu1 %500 }
 0x12b   : > { %v496_v39 = vpop.permute.xlu1 %495 }
 0x152   : > { %v632_v26 = vpop.f32.mrf.mxu0 }
 0x153   : > { %v633_v32 = vadd.f32 %v632_v26, %v491_v28 }
 0x158   : > { %v670_v31 = vpop.f32.mrf.mxu2 }
 0x159   : > { %v671_v40 = vadd.f32 %v670_v31, %v491_v28 }
 0x15a   : > { %v634_v36 = vpop.f32.mrf.mxu0 }
 0x15b   : > { %v635_v48 = vadd.f32 %v634_v36, %v496_v39 }
 0x160   : > { %v672_v41 = vpop.f32.mrf.mxu2 }
 0x161   : > { %v673_v51 = vadd.f32 %v672_v41, %v496_v39 }
 0x162   : > { %v651_v34 = vpop.f32.mrf.mxu1 }
 0x163   : > { %v652_v35 = vadd.f32 %v651_v34, %v633_v32  ;;  %v637_v50 = vpop.f32.mrf.mxu0 }
 0x164   : > { %v638_v57 = vadd.f32 %v637_v50, %v501_v30 }
 0x165   : > { %v699_v38 = vmax.f32 %v652_v35, 0.0 }
 0x167   : > { %v2218_v9 = vmul.f32 %v2215_v37, %v699_v38 }
 0x168   : > { %v689_v42 = vpop.f32.mrf.mxu3 }
 0x169   : > { %v690_v43 = vadd.f32 %v689_v42, %v671_v40  ;;  %875 = vrot.lane.b32.xlu2 %v2218_v9, %s1920_s10  ;;  %915 = vrot.lane.b32.xlu1 %v2218_v9, %s1918_s8  ;;  %v675_v13 = vpop.f32.mrf.mxu2 }
 0x16a   : > { %827 = vrot.lane.b32.xlu0 %v2218_v9, %s1921_s11  ;;  %v653_v47 = vpop.f32.mrf.mxu1  ;;  %v676_v2 = vadd.f32 %v675_v13, %v501_v30 }
 0x16b   : > { %v700_v49 = vmax.f32 %v690_v43, 0.0  ;;  %v654_v53 = vadd.f32 %v653_v47, %v635_v48  ;;  %v639_v1 = vpop.f32.mrf.mxu0 }
 0x16c   : > { %v640_v6 = vadd.f32 %v639_v1, %v506_v0 }
 0x16d   : > { %v2227_v52 = vmul.f32 %v1461_v44, %v700_v49  ;;  %v701_v56 = vmax.f32 %v654_v53, 0.0 }
 0x16f   : > { %v867_v54 = vpack.c.bf16 %v2227_v52, %v2218_v9  ;;  %v2238_v61 = vmul.f32 %v2215_v37, %v701_v56 }
 0x170   : > { %v691_v55 = vpop.f32.mrf.mxu3 }
 0x171   : > { %v692_v58 = vadd.f32 %v691_v55, %v673_v51  ;;  %787 = vrot.lane.b32.xlu1 %v2218_v9, %s1922_s12  ;;  %835 = vrot.lane.b32.xlu2 %v2227_v52, %s1921_s11  ;;  %871 = vst [vmem:[#allocation2 + $0x80] sm:$0xff] %v867_v54  ;;  %v677_v11 = vpop.f32.mrf.mxu2  ;;  %v1834_v22 = vpack.i.bf16 %v2238_v61, %v2218_v9 }
 0x172   : > { %923 = vrot.lane.b32.xlu0 %v2227_v52, %s1918_s8  ;;  %v656_v59 = vpop.f32.mrf.mxu1  ;;  %v678_v19 = vadd.f32 %v677_v11, %v506_v0 }
 0x173   : > { %v702_v60 = vmax.f32 %v692_v58, 0.0  ;;  %v657_v63 = vadd.f32 %v656_v59, %v638_v57 }
 0x175   : > { %v2240_v62 = vmul.f32 %v1461_v44, %v702_v60  ;;  %v703_v5 = vmax.f32 %v657_v63, 0.0 }
 0x177   : > { %v868_v3 = vpack.c.bf16 %v2240_v62, %v2238_v61  ;;  %v2251_v16 = vmul.f32 %v2215_v37, %v703_v5  ;;  %v1844_v28 = vpack.i.bf16 %v2240_v62, %v2227_v52 }
 0x178   : > { %v694_v4 = vpop.f32.mrf.mxu3 }
 0x179   : > { %v695_v7 = vadd.f32 %v694_v4, %v676_v2  ;;  %883 = vrot.lane.b32.xlu1 %v2227_v52, %s1920_s10  ;;  %917 = vrot.lane.b32.xlu2 %v2238_v61, %s1918_s8  ;;  %872 = vst [vmem:[#allocation2 + $0x88] sm:$0xff] %v868_v3 }
 0x17a   : > { %795 = vrot.lane.b32.xlu0 %v2227_v52, %s1922_s12  ;;  %v658_v10 = vpop.f32.mrf.mxu1 }
 0x17b   : > { %v704_v12 = vmax.f32 %v695_v7, 0.0  ;;  %v659_v18 = vadd.f32 %v658_v10, %v640_v6 }
 0x17d   : > { %v2253_v17 = vmul.f32 %v1461_v44, %v704_v12  ;;  %v705_v23 = vmax.f32 %v659_v18, 0.0 }
 0x17f   : > { %v869_v20 = vpack.c.bf16 %v2253_v17, %v2251_v16  ;;  %v713_v26 = vmul.f32 %v2215_v37, %v705_v23 }
 0x180   : > { %v696_v21 = vpop.f32.mrf.mxu3 }
 0x181   : > { %v697_v24 = vadd.f32 %v696_v21, %v678_v19  ;;  %829 = vrot.lane.b32.xlu1 %v2238_v61, %s1921_s11  ;;  %789 = vrot.lane.b32.xlu2 %v2238_v61, %s1922_s12  ;;  %873 = vst [vmem:[#allocation2 + $0x90] sm:$0xff] %v869_v20  ;;  %v1854_v30 = vpack.i.bf16 %v713_v26, %v2251_v16  ;;  %v1065_v21 = vld [vmem:[%s2601_s4] sm:$0xff] }
 0x182   : > { %1835 = vrot.lane.b32.xlu0 %v1834_v22, %s1919_s9 }
 0x183   : > { %v706_v25 = vmax.f32 %v697_v24, 0.0 }
 0x185   : > { %v2265_v27 = vmul.f32 %v1461_v44, %v706_v25 }
 0x187   : > { %v870_v29 = vpack.c.bf16 %v2265_v27, %v713_v26  ;;  %v1864_v32 = vpack.i.bf16 %v2265_v27, %v2253_v17 }
 0x189   : > { %1845 = vrot.lane.b32.xlu1 %v1844_v28, %s1919_s9  ;;  %1840 = vrot.lane.b32.xlu2 %v1834_v22, %s1923_s13  ;;  %874 = vst [vmem:[#allocation2 + $0x98] sm:$0xff] %v870_v29 }
 0x18a   : > { %877 = vrot.lane.b32.xlu0 %v2238_v61, %s1920_s10 }
 0x191   : > { %925 = vrot.lane.b32.xlu1 %v2240_v62, %s1918_s8  ;;  %885 = vrot.lane.b32.xlu2 %v2240_v62, %s1920_s10 }
 0x192   : > { %837 = vrot.lane.b32.xlu0 %v2240_v62, %s1921_s11 }
 0x199   : > { %797 = vrot.lane.b32.xlu1 %v2240_v62, %s1922_s12  ;;  %831 = vrot.lane.b32.xlu2 %v2251_v16, %s1921_s11 }
 0x19a   : > { %1850 = vrot.lane.b32.xlu0 %v1844_v28, %s1923_s13 }
 0x1a1   : > { %719 = vrot.lane.b32.xlu1 %v2251_v16, %s1924_s14  ;;  %919 = vrot.lane.b32.xlu2 %v2251_v16, %s1918_s8 }
 0x1a2   : > { %879 = vrot.lane.b32.xlu0 %v2251_v16, %s1920_s10 }
 0x1a9   : > { %839 = vrot.lane.b32.xlu1 %v2253_v17, %s1921_s11  ;;  %791 = vrot.lane.b32.xlu2 %v2251_v16, %s1922_s12 }
 0x1aa   : > { %727 = vrot.lane.b32.xlu0 %v2253_v17, %s1924_s14 }
 0x1b1   : > { %927 = vrot.lane.b32.xlu1 %v2253_v17, %s1918_s8  ;;  %887 = vrot.lane.b32.xlu2 %v2253_v17, %s1920_s10 }
 0x1b2   : > { %833 = vrot.lane.b32.xlu0 %v713_v26, %s1921_s11 }
 0x1b9   : > { %799 = vrot.lane.b32.xlu1 %v2253_v17, %s1922_s12  ;;  %1855 = vrot.lane.b32.xlu2 %v1854_v30, %s1919_s9 }
 0x1ba   : > { %921 = vrot.lane.b32.xlu0 %v713_v26, %s1918_s8 }
 0x1c1   : > { %881 = vrot.lane.b32.xlu1 %v713_v26, %s1920_s10  ;;  %721 = vrot.lane.b32.xlu2 %v713_v26, %s1924_s14 }
 0x1c2   : > { %793 = vrot.lane.b32.xlu0 %v713_v26, %s1922_s12 }
 0x1c3   : > { %v876_v31 = vpop.permute.xlu2 %875 }
 0x1c9   : > { %1865 = vrot.lane.b32.xlu1 %v1864_v32, %s1919_s9  ;;  %841 = vrot.lane.b32.xlu2 %v2265_v27, %s1921_s11 }
 0x1ca   : > { %1860 = vrot.lane.b32.xlu0 %v1854_v30, %s1923_s13 }
 0x1cb   : > { %v836_v33 = vpop.permute.xlu2 %835 }
 0x1d1   : > { %723 = vrot.lane.b32.xlu1 %v2227_v52, %s1924_s14  ;;  %929 = vrot.lane.b32.xlu2 %v2265_v27, %s1918_s8 }
 0x1d2   : > { %889 = vrot.lane.b32.xlu0 %v2265_v27, %s1920_s10 }
 0x1d3   : > { %v2322_v34 = vpop.permute.xlu2 %917 }
 0x1d9   : > { %993 = vrot.lane.b32.xlu1 %v713_v26, %s2605_s18  ;;  %801 = vrot.lane.b32.xlu2 %v2265_v27, %s1922_s12 }
 0x1da   : > { %717 = vrot.lane.b32.xlu0 %v2238_v61, %s1924_s14 }
 0x1db   : > { %v916_v35 = vpop.permute.xlu1 %915  ;;  %v2329_v36 = vpop.permute.xlu2 %789 }
 0x1dc   : > { %v828_v37 = vpop.permute.xlu0 %827 }
 0x1dd   : > { %v843_v38 = vsel %vm365_vm7, %v828_v37, %v836_v33  ;;  %v847_v39 = vsel %vm365_vm7, %v836_v33, %v828_v37 }
 0x1de   : > { %v851_v40 = vmul.f32 %v2066_v14, %v847_v39  ;;  %v852_v41 = vmul.f32 %v2069_v15, %v843_v38 }
 0x1e0   : > { %v859_v42 = vpack.c.bf16 %v852_v41, %v851_v40 }
 0x1e1   : > { %1870 = vrot.lane.b32.xlu1 %v1864_v32, %s1923_s13  ;;  %715 = vrot.lane.b32.xlu2 %v2218_v9, %s1924_s14 }
 0x1e2   : > { %863 = vst [vmem:[#allocation2 + $0x60] sm:$0xff] %v859_v42  ;;  %991 = vrot.lane.b32.xlu0 %v2251_v16, %s2605_s18 }
 0x1e3   : > { %v788_v43 = vpop.permute.xlu1 %787  ;;  %v2342_v44 = vpop.permute.xlu2 %1840 }
 0x1e4   : > { %v924_v47 = vpop.permute.xlu0 %923 }
 0x1e5   : > { %v931_v48 = vsel %vm411_vm2, %v916_v35, %v924_v47  ;;  %v935_v49 = vsel %vm411_vm2, %v924_v47, %v916_v35  ;;  %v1842_v47 = vunpack.i.l.bf16 %v2342_v44 }
 0x1e6   : > { %v939_v50 = vmul.f32 %v2066_v14, %v931_v48  ;;  %v940_v51 = vmul.f32 %v2069_v15, %v935_v49 }
 0x1e8   : > { %v947_v53 = vpack.c.bf16 %v940_v51, %v939_v50 }
 0x1e9   : > { %729 = vrot.lane.b32.xlu1 %v2265_v27, %s1924_s14  ;;  %725 = vrot.lane.b32.xlu2 %v2240_v62, %s1924_s14  ;;  %s1928_s14 = smov 96  }
 0x1ea   : > { %951 = vst [vmem:[#allocation2 + $0xc0] sm:$0xff] %v947_v53  ;;  %1001 = vrot.lane.b32.xlu0 %v2265_v27, %s2605_s18 }
 0x1eb   : > { %v884_v54 = vpop.permute.xlu1 %883  ;;  %v886_v55 = vpop.permute.xlu2 %885 }
 0x1ec   : > { %v891_v56 = vsel %vm390_vm6, %v876_v31, %v884_v54  ;;  %v895_v57 = vsel %vm390_vm6, %v884_v54, %v876_v31  ;;  %v796_v58 = vpop.permute.xlu0 %795 }
 0x1ed   : > { %v899_v13 = vmul.f32 %v2097_v45, %v891_v56  ;;  %v900_v59 = vmul.f32 %v2100_v46, %v895_v57  ;;  %v803_v60 = vsel %vm344_vm8, %v788_v43, %v796_v58  ;;  %v807_v63 = vsel %vm344_vm8, %v796_v58, %v788_v43 }
 0x1ee   : > { %v811_v0 = vmul.f32 %v2097_v45, %v807_v63  ;;  %v812_v1 = vmul.f32 %v2100_v46, %v803_v60  ;;  %v1843_v43 = vunpack.i.h.bf16 %v2342_v44 }
 0x1ef   : > { %v907_v2 = vpack.c.bf16 %v900_v59, %v899_v13 }
 0x1f0   : > { %v819_v3 = vpack.c.bf16 %v812_v1, %v811_v0 }
 0x1f1   : > { %911 = vst [vmem:[#allocation2 + $0xa0] sm:$0xff] %v907_v2  ;;  %987 = vrot.lane.b32.xlu1 %v2218_v9, %s2605_s18  ;;  %999 = vrot.lane.b32.xlu2 %v2253_v17, %s2605_s18 }
 0x1f2   : > { %823 = vst [vmem:[#allocation2 + $0x40] sm:$0xff] %v819_v3  ;;  %995 = vrot.lane.b32.xlu0 %v2227_v52, %s2605_s18 }
 0x1f3   : > { %v830_v4 = vpop.permute.xlu1 %829  ;;  %v2374_v5 = vpop.permute.xlu2 %831 }
 0x1f4   : > { %v1836_v6 = vpop.permute.xlu0 %1835 }
 0x1f5   : > { %v1838_v9 = vunpack.i.h.bf16 %v1836_v6  ;;  %v1837_v11 = vunpack.i.l.bf16 %v1836_v6 }
 0x1f9   : > { %997 = vrot.lane.b32.xlu1 %v2240_v62, %s2605_s18  ;;  %989 = vrot.lane.b32.xlu2 %v2238_v61, %s2605_s18 }
 0x1fb   : > { %v1846_v7 = vpop.permute.xlu1 %1845  ;;  %v2380_v10 = vpop.permute.xlu2 %919 }
 0x1fc   : > { %v1848_v12 = vunpack.i.h.bf16 %v1846_v7  ;;  %v1847_v16 = vunpack.i.l.bf16 %v1846_v7  ;;  %v878_v17 = vpop.permute.xlu0 %877 }
 0x1fd   : > { %v892_v52 = vsel %vm390_vm6, %v878_v17, %v886_v55  ;;  %v896_v18 = vsel %vm390_vm6, %v886_v55, %v878_v17 }
 0x1fe   : > { %v971_v62 = vsel %vm432_vm3, %v1837_v11, %v1847_v16  ;;  %v972_v61 = vsel %vm432_vm3, %v1838_v9, %v1848_v12  ;;  %v975_v19 = vsel %vm432_vm3, %v1847_v16, %v1837_v11  ;;  %v976_v20 = vsel %vm432_vm3, %v1848_v12, %v1838_v9 }
 0x1ff   : > { %v979_v22 = vpack.c.bf16 %v975_v19, %v971_v62  ;;  %v980_v23 = vpack.c.bf16 %v976_v20, %v972_v61  ;;  %v901_v24 = vmul.f32 %v2097_v45, %v892_v52  ;;  %v902_v25 = vmul.f32 %v2100_v46, %v896_v18 }
 0x201   : > { %983 = vst [vmem:[#allocation2 + $0xe0] sm:$0xff] %v979_v22  ;;  %v908_v26 = vpack.c.bf16 %v902_v25, %v901_v24  ;;  %1068 = vperm.xlu2 %1832, %v1065_v21  }
 0x202   : > { %984 = vst [vmem:[#allocation2 + $0xe8] sm:$0xff] %v980_v23 }
 0x203   : > { %912 = vst [vmem:[#allocation2 + $0xa8] sm:$0xff] %v908_v26  ;;  %v926_v27 = vpop.permute.xlu1 %925  ;;  %v2399_v28 = vpop.permute.xlu2 %791 }
 0x204   : > { %v932_v29 = vsel %vm411_vm2, %v2322_v34, %v926_v27  ;;  %v936_v30 = vsel %vm411_vm2, %v926_v27, %v2322_v34  ;;  %v838_v31 = vpop.permute.xlu0 %837 }
 0x205   : > { %v941_v32 = vmul.f32 %v2066_v14, %v932_v29  ;;  %v942_v33 = vmul.f32 %v2069_v15, %v936_v30  ;;  %v844_v35 = vsel %vm365_vm7, %v830_v4, %v838_v31  ;;  %v848_v37 = vsel %vm365_vm7, %v838_v31, %v830_v4 }
 0x206   : > { %v853_v38 = vmul.f32 %v2066_v14, %v848_v37  ;;  %v854_v39 = vmul.f32 %v2069_v15, %v844_v35 }
 0x207   : > { %v948_v40 = vpack.c.bf16 %v942_v33, %v941_v32 }
 0x208   : > { %v860_v41 = vpack.c.bf16 %v854_v39, %v853_v38 }
 0x209   : > { %952 = vst [vmem:[#allocation2 + $0xc8] sm:$0xff] %v948_v40 }
 0x20a   : > { %864 = vst [vmem:[#allocation2 + $0x68] sm:$0xff] %v860_v41 }
 0x20b   : > { %v798_v34 = vpop.permute.xlu1 %797  ;;  %v888_v42 = vpop.permute.xlu2 %887 }
 0x20c   : > { %v804_v48 = vsel %vm344_vm8, %v2329_v36, %v798_v34  ;;  %v808_v49 = vsel %vm344_vm8, %v798_v34, %v2329_v36  ;;  %v1851_v50 = vpop.permute.xlu0 %1850 }
 0x20d   : > { %v813_v51 = vmul.f32 %v2097_v45, %v808_v49  ;;  %v814_v53 = vmul.f32 %v2100_v46, %v804_v48  ;;  %v1853_v54 = vunpack.i.h.bf16 %v1851_v50  ;;  %v1852_v55 = vunpack.i.l.bf16 %v1851_v50 }
 0x20f   : > { %v820_v56 = vpack.c.bf16 %v814_v53, %v813_v51  ;;  %v771_v57 = vsel %vm327_vm9, %v1842_v47, %v1852_v55  ;;  %v772_v44 = vsel %vm327_vm9, %v1843_v43, %v1853_v54  ;;  %v775_v58 = vsel %vm327_vm9, %v1852_v55, %v1842_v47 }
 0x210   : > { %v776_v36 = vsel %vm327_vm9, %v1853_v54, %v1843_v43  ;;  %v779_v13 = vpack.c.bf16 %v771_v57, %v775_v58 }
 0x211   : > { %824 = vst [vmem:[#allocation2 + $0x48] sm:$0xff] %v820_v56  ;;  %v780_v59 = vpack.c.bf16 %v772_v44, %v776_v36  ;;  %v1737_v58 = vld [vmem:[#allocation2 + $0x64] sm:$0xf0]  ;;  %v1606_v36 = vld [vmem:[#allocation2 + $0x68] sm:$0xf0] }
 0x212   : > { %783 = vst [vmem:[#allocation2 + $0x20] sm:$0xff] %v779_v13 }
 0x213   : > { %784 = vst [vmem:[#allocation2 + $0x28] sm:$0xff] %v780_v59  ;;  %v720_v60 = vpop.permute.xlu1 %719  ;;  %v2433_v63 = vpop.permute.xlu2 %1855 }
 0x214   : > { %v880_v0 = vpop.permute.xlu0 %879 }
 0x215   : > { %v893_v1 = vsel %vm390_vm6, %v880_v0, %v888_v42  ;;  %v897_v2 = vsel %vm390_vm6, %v888_v42, %v880_v0  ;;  %v1604_v0 = vld [vmem:[#allocation2 + $0x60] sm:$0xf] }
 0x216   : > { %v903_v3 = vmul.f32 %v2097_v45, %v893_v1  ;;  %v904_v4 = vmul.f32 %v2100_v46, %v897_v2  ;;  %v1736_v1 = vld [vmem:[#allocation2 + $0x64] sm:$0xf] }
 0x218   : > { %v909_v6 = vpack.c.bf16 %v904_v4, %v903_v3  ;;  %v1605_v4 = vor.u32 %v1737_v58, %v1604_v0  ;;  %v1753_v58 = vld [vmem:[#allocation2 + $0xe4] sm:$0xf0] }
 0x21a   : > { %913 = vst [vmem:[#allocation2 + $0xb0] sm:$0xff] %v909_v6  ;;  %v1609_v6 = vor.u32 %v1736_v1, %v1606_v36  ;;  %v1752_v36 = vld [vmem:[#allocation2 + $0xe4] sm:$0xf] }
 0x21b   : > { %v840_v7 = vpop.permute.xlu1 %839  ;;  %v2441_v9 = vpop.permute.xlu2 %721 }
 0x21c   : > { %v845_v11 = vsel %vm365_vm7, %v2374_v5, %v840_v7  ;;  %v849_v12 = vsel %vm365_vm7, %v840_v7, %v2374_v5  ;;  %v728_v16 = vpop.permute.xlu0 %727 }
 0x21d   : > { %v855_v17 = vmul.f32 %v2066_v14, %v849_v12  ;;  %v856_v52 = vmul.f32 %v2069_v15, %v845_v11  ;;  %v733_v18 = vsel %vm306_vm10, %v720_v60, %v728_v16  ;;  %v737_v62 = vsel %vm306_vm10, %v728_v16, %v720_v60 }
 0x21e   : > { %v743_v61 = vmul.f32 %v2066_v14, %v737_v62  ;;  %v744_v19 = vmul.f32 %v2069_v15, %v733_v18  ;;  %v1858_v12 = vunpack.i.h.bf16 %v2433_v63  ;;  %v1857_v16 = vunpack.i.l.bf16 %v2433_v63 }
 0x21f   : > { %v861_v20 = vpack.c.bf16 %v856_v52, %v855_v17 }
 0x220   : > { %v749_v21 = vpack.c.bf16 %v744_v19, %v743_v61 }
 0x221   : > { %865 = vst [vmem:[#allocation2 + $0x70] sm:$0xff] %v861_v20 }
 0x222   : > { %753 = vst [vmem:[#allocation2 + $0x10] sm:$0xff] %v749_v21 }
 0x223   : > { %v928_v5 = vpop.permute.xlu1 %927  ;;  %v842_v22 = vpop.permute.xlu2 %841 }
 0x224   : > { %v933_v23 = vsel %vm411_vm2, %v2380_v10, %v928_v5  ;;  %v937_v24 = vsel %vm411_vm2, %v928_v5, %v2380_v10  ;;  %v834_v25 = vpop.permute.xlu0 %833 }
 0x225   : > { %v943_v26 = vmul.f32 %v2066_v14, %v933_v23  ;;  %v944_v27 = vmul.f32 %v2069_v15, %v937_v24  ;;  %v846_v29 = vsel %vm365_vm7, %v834_v25, %v842_v22  ;;  %v850_v30 = vsel %vm365_vm7, %v842_v22, %v834_v25 }
 0x226   : > { %v857_v31 = vmul.f32 %v2066_v14, %v850_v30  ;;  %v858_v32 = vmul.f32 %v2069_v15, %v846_v29  ;;  %v1733_v30 = vld [vmem:[#allocation2 + $0x44] sm:$0xf0] }
 0x227   : > { %v949_v33 = vpack.c.bf16 %v944_v27, %v943_v26 }
 0x228   : > { %v862_v35 = vpack.c.bf16 %v858_v32, %v857_v31  ;;  %v1612_v51 = vld [vmem:[#allocation2 + $0x70] sm:$0xf]  ;;  %v1738_v53 = vld [vmem:[#allocation2 + $0x74] sm:$0xf]  ;;  %v1590_v31 = vld [vmem:[#allocation2 + $0x48] sm:$0xf0] }
 0x229   : > { %953 = vst [vmem:[#allocation2 + $0xd0] sm:$0xff] %v949_v33 }
 0x22a   : > { %866 = vst [vmem:[#allocation2 + $0x78] sm:$0xff] %v862_v35 }
 0x22b   : > { %v800_v10 = vpop.permute.xlu1 %799  ;;  %v930_v37 = vpop.permute.xlu2 %929 }
 0x22c   : > { %v805_v38 = vsel %vm344_vm8, %v2399_v28, %v800_v10  ;;  %v809_v39 = vsel %vm344_vm8, %v800_v10, %v2399_v28  ;;  %v922_v40 = vpop.permute.xlu0 %921 }
 0x22d   : > { %v815_v41 = vmul.f32 %v2097_v45, %v809_v39  ;;  %v816_v34 = vmul.f32 %v2100_v46, %v805_v38  ;;  %v934_v42 = vsel %vm411_vm2, %v922_v40, %v930_v37  ;;  %v938_v43 = vsel %vm411_vm2, %v930_v37, %v922_v40  ;;  %v1588_v40 = vld [vmem:[#allocation2 + $0x40] sm:$0xf] }
 0x22e   : > { %v945_v47 = vmul.f32 %v2066_v14, %v934_v42  ;;  %v946_v48 = vmul.f32 %v2069_v15, %v938_v43  ;;  %v1589_v43 = vor.u32 %v1733_v30, %v1588_v40  ;;  %vm1261_vm2 = vcmask 261120  }
 0x22f   : > { %v821_v49 = vpack.c.bf16 %v816_v34, %v815_v41  ;;  %v1732_v41 = vld [vmem:[#allocation2 + $0x44] sm:$0xf] }
 0x230   : > { %v950_v50 = vpack.c.bf16 %v946_v48, %v945_v47  ;;  %v1593_v47 = vor.u32 %v1732_v41, %v1590_v31 }
 0x231   : > { %825 = vst [vmem:[#allocation2 + $0x50] sm:$0xff] %v821_v49  ;;  %v1739_v28 = vld [vmem:[#allocation2 + $0x74] sm:$0xf0]  ;;  %v1614_v54 = vld [vmem:[#allocation2 + $0x78] sm:$0xf0] }
 0x232   : > { %954 = vst [vmem:[#allocation2 + $0xd8] sm:$0xff] %v950_v50  ;;  %v1613_v55 = vor.u32 %v1739_v28, %v1612_v51  ;;  %v1617_v56 = vor.u32 %v1738_v53, %v1614_v54 }
 0x233   : > { %v882_v57 = vpop.permute.xlu1 %881  ;;  %v802_v44 = vpop.permute.xlu2 %801 }
 0x234   : > { %v794_v13 = vpop.permute.xlu0 %793  ;;  %1265 = vmatpush.bf16.msrb.mxu1 %v1613_v55  ;;  %1304 = vmatpush.bf16.msrb.mxu0 %v1617_v56 }
 0x235   : > { %v806_v59 = vsel %vm344_vm8, %v794_v13, %v802_v44  ;;  %v810_v60 = vsel %vm344_vm8, %v802_v44, %v794_v13  ;;  %v1670_v13 = vld [vmem:[#allocation2 + $0xe8] sm:$0xf0] }
 0x236   : > { %v817_v2 = vmul.f32 %v2097_v45, %v810_v60  ;;  %v818_v3 = vmul.f32 %v2100_v46, %v806_v59 }
 0x238   : > { %v822_v7 = vpack.c.bf16 %v818_v3, %v817_v2  ;;  %1266 = vmatpush.bf16.msrb.mxu1 %v1605_v4  ;;  %1305 = vmatpush.bf16.msrb.mxu0 %v1609_v6  ;;  %v1596_v63 = vld [vmem:[#allocation2 + $0x50] sm:$0xf]  ;;  %v1734_v23 = vld [vmem:[#allocation2 + $0x54] sm:$0xf]  ;;  %v1673_v4 = vor.u32 %v1752_v36, %v1670_v13  ;;  %v1744_v36 = vld [vmem:[#allocation2 + $0xa4] sm:$0xf] }
 0x239   : > { %v1751_v6 = vld [vmem:[#allocation2 + $0xd4] sm:$0xf0] }
 0x23a   : > { %826 = vst [vmem:[#allocation2 + $0x58] sm:$0xff] %v822_v7  ;;  %v1662_v7 = vld [vmem:[#allocation2 + $0xd8] sm:$0xf0] }
 0x23b   : > { %v1866_v11 = vpop.permute.xlu1 %1865  ;;  %v716_v22 = vpop.permute.xlu2 %715 }
 0x23c   : > { %v1868_v17 = vunpack.i.h.bf16 %v1866_v11  ;;  %v1867_v52 = vunpack.i.l.bf16 %v1866_v11  ;;  %v2493_v18 = vpop.permute.xlu0 %1860 }
 0x23e   : > { %v973_v62 = vsel %vm432_vm3, %v1857_v16, %v1867_v52  ;;  %v974_v61 = vsel %vm432_vm3, %v1858_v12, %v1868_v17  ;;  %v977_v19 = vsel %vm432_vm3, %v1867_v52, %v1857_v16  ;;  %v978_v20 = vsel %vm432_vm3, %v1868_v17, %v1858_v12  ;;  %v1660_v12 = vld [vmem:[#allocation2 + $0xd0] sm:$0xf]  ;;  %v1750_v16 = vld [vmem:[#allocation2 + $0xd4] sm:$0xf] }
 0x23f   : > { %v981_v21 = vpack.c.bf16 %v977_v19, %v973_v62  ;;  %v982_v5 = vpack.c.bf16 %v978_v20, %v974_v61  ;;  %v1661_v17 = vor.u32 %v1751_v6, %v1660_v12  ;;  %v1665_v52 = vor.u32 %v1750_v16, %v1662_v7  ;;  %v1749_v62 = vld [vmem:[#allocation2 + $0xc4] sm:$0xf0]  ;;  %v1654_v61 = vld [vmem:[#allocation2 + $0xc8] sm:$0xf0] }
 0x240   : > { %v1863_v20 = vunpack.i.h.bf16 %v2493_v18  ;;  %vm1351_vm3 = vcmask 785408  }
 0x241   : > { %985 = vst [vmem:[#allocation2 + $0xf0] sm:$0xff] %v981_v21  ;;  %v1735_v24 = vld [vmem:[#allocation2 + $0x54] sm:$0xf0]  ;;  %v1598_v25 = vld [vmem:[#allocation2 + $0x58] sm:$0xf0]  ;;  %v1862_v21 = vunpack.i.l.bf16 %v2493_v18 }
 0x242   : > { %986 = vst [vmem:[#allocation2 + $0xf8] sm:$0xff] %v982_v5  ;;  %v1597_v26 = vor.u32 %v1735_v24, %v1596_v63  ;;  %v1601_v27 = vor.u32 %v1734_v23, %v1598_v25  ;;  %v1652_v24 = vld [vmem:[#allocation2 + $0xc0] sm:$0xf]  ;;  %v1748_v25 = vld [vmem:[#allocation2 + $0xc4] sm:$0xf] }
 0x243   : > { %v724_v29 = vpop.permute.xlu1 %723  ;;  %v726_v54 = vpop.permute.xlu2 %725  ;;  %v1657_v30 = vor.u32 %v1748_v25, %v1654_v61  ;;  %v1572_v61 = vld [vmem:[#allocation2 + $0x20] sm:$0xf] }
 0x244   : > { %v731_v32 = vsel %vm306_vm10, %v716_v22, %v724_v29  ;;  %v735_v33 = vsel %vm306_vm10, %v724_v29, %v716_v22  ;;  %v890_v35 = vpop.permute.xlu0 %889  ;;  %1267 = vmatpush.bf16.msrb.mxu1 %v1597_v26  ;;  %1306 = vmatpush.bf16.msrb.mxu0 %v1601_v27  ;;  %v1653_v29 = vor.u32 %v1749_v62, %v1652_v24 }
 0x245   : > { %v739_v10 = vmul.f32 %v2066_v14, %v735_v33  ;;  %v740_v37 = vmul.f32 %v2069_v15, %v731_v32  ;;  %v894_v38 = vsel %vm390_vm6, %v882_v57, %v890_v35  ;;  %v898_v39 = vsel %vm390_vm6, %v890_v35, %v882_v57  ;;  %v1668_v57 = vld [vmem:[#allocation2 + $0xe0] sm:$0xf] }
 0x246   : > { %v905_v34 = vmul.f32 %v2097_v45, %v894_v38  ;;  %v906_v42 = vmul.f32 %v2100_v46, %v898_v39  ;;  %v1669_v3 = vor.u32 %v1753_v58, %v1668_v57  ;;  %v1636_v58 = vld [vmem:[#allocation2 + $0xa0] sm:$0xf] }
 0x247   : > { %v747_v48 = vpack.c.bf16 %v740_v37, %v739_v10 }
 0x248   : > { %v910_v49 = vpack.c.bf16 %v906_v42, %v905_v34  ;;  %1268 = vmatpush.bf16.msrb.mxu1 %v1589_v43  ;;  %1307 = vmatpush.bf16.msrb.mxu0 %v1593_v47  ;;  %v1676_v50 = vld [vmem:[#allocation2 + $0xf0] sm:$0xf]  ;;  %v1754_v51 = vld [vmem:[#allocation2 + $0xf4] sm:$0xf] }
 0x249   : > { %751 = vst [vmem:[#allocation2] sm:$0xff] %v747_v48  ;;  %v1755_v53 = vld [vmem:[#allocation2 + $0xf4] sm:$0xf0]  ;;  %v1678_v28 = vld [vmem:[#allocation2 + $0xf8] sm:$0xf0] }
 0x24a   : > { %914 = vst [vmem:[#allocation2 + $0xb8] sm:$0xff] %v910_v49  ;;  %v1677_v55 = vor.u32 %v1755_v53, %v1676_v50  ;;  %v1681_v56 = vor.u32 %v1754_v51, %v1678_v28  ;;  %v1644_v34 = vld [vmem:[#allocation2 + $0xb0] sm:$0xf]  ;;  %v1746_v42 = vld [vmem:[#allocation2 + $0xb4] sm:$0xf] }
 0x24b   : > { %v2515_v44 = vpop.permute.xlu1 %993  ;;  %v1000_v5 = vpop.permute.xlu2 %999  ;;  %v1745_v49 = vld [vmem:[#allocation2 + $0xa4] sm:$0xf0]  ;;  %v1638_v50 = vld [vmem:[#allocation2 + $0xa8] sm:$0xf0] }
 0x24c   : > { %v718_v59 = vpop.permute.xlu0 %717  ;;  %1278 = vmatpush.bf16.msrb.mxu3 %v1677_v55  ;;  %1317 = vmatpush.bf16.msrb.mxu2 %v1681_v56 }
 0x24d   : > { %v732_v60 = vsel %vm306_vm10, %v718_v59, %v726_v54  ;;  %v736_v0 = vsel %vm306_vm10, %v726_v54, %v718_v59  ;;  %v1637_v59 = vor.u32 %v1745_v49, %v1636_v58 }
 0x24e   : > { %v741_v1 = vmul.f32 %v2066_v14, %v736_v0  ;;  %v742_v2 = vmul.f32 %v2069_v15, %v732_v60  ;;  %v1641_v60 = vor.u32 %v1744_v36, %v1638_v50 }
 0x250   : > { %v748_v11 = vpack.c.bf16 %v742_v2, %v741_v1  ;;  %1279 = vmatpush.bf16.msrb.mxu3 %v1669_v3  ;;  %1318 = vmatpush.bf16.msrb.mxu2 %v1673_v4  ;;  %v1743_v1 = vld [vmem:[#allocation2 + $0x94] sm:$0xf0]  ;;  %v1556_v58 = vld [vmem:[#allocation2] sm:$0xf] }
 0x251   : > { %v1747_v39 = vld [vmem:[#allocation2 + $0xb4] sm:$0xf0]  ;;  %v1646_v40 = vld [vmem:[#allocation2 + $0xb8] sm:$0xf0] }
 0x252   : > { %752 = vst [vmem:[#allocation2 + $0x8] sm:$0xff] %v748_v11  ;;  %v1645_v43 = vor.u32 %v1747_v39, %v1644_v34  ;;  %v1649_v47 = vor.u32 %v1746_v42, %v1646_v40  ;;  %v1726_v39 = vld [vmem:[#allocation2 + $0x14] sm:$0xf] }
 0x253   : > { %v1871_v19 = vpop.permute.xlu1 %1870 }
 0x254   : > { %v1873_v22 = vunpack.i.h.bf16 %v1871_v19  ;;  %v1872_v63 = vunpack.i.l.bf16 %v1871_v19  ;;  %v992_v23 = vpop.permute.xlu0 %991  ;;  %1280 = vmatpush.bf16.msrb.mxu3 %v1661_v17  ;;  %1319 = vmatpush.bf16.msrb.mxu2 %v1665_v52  ;;  %v1742_v17 = vld [vmem:[#allocation2 + $0x94] sm:$0xf]  ;;  %v1729_v19 = vld [vmem:[#allocation2 + $0x24] sm:$0xf0] }
 0x255   : > { %v1005_v26 = vsel %vm449_vm11, %v992_v23, %v1000_v5  ;;  %v1009_v27 = vsel %vm449_vm11, %v1000_v5, %v992_v23  ;;  %v1622_v23 = vld [vmem:[#allocation2 + $0x88] sm:$0xf0] }
 0x256   : > { %v773_v31 = vsel %vm327_vm9, %v1862_v21, %v1872_v63  ;;  %v774_v18 = vsel %vm327_vm9, %v1863_v20, %v1873_v22  ;;  %v777_v32 = vsel %vm327_vm9, %v1872_v63, %v1862_v21  ;;  %v778_v33 = vsel %vm327_vm9, %v1873_v22, %v1863_v20  ;;  %v1741_v20 = vld [vmem:[#allocation2 + $0x84] sm:$0xf0]  ;;  %v1728_v22 = vld [vmem:[#allocation2 + $0x24] sm:$0xf]  ;;  %v1574_v63 = vld [vmem:[#allocation2 + $0x28] sm:$0xf0] }
 0x257   : > { %v781_v35 = vpack.c.bf16 %v773_v31, %v777_v32  ;;  %v782_v10 = vpack.c.bf16 %v774_v18, %v778_v33  ;;  %v1015_v37 = vmul.f32 %v2097_v45, %v1005_v26  ;;  %v1016_v38 = vmul.f32 %v2100_v46, %v1009_v27  ;;  %v1620_v26 = vld [vmem:[#allocation2 + $0x80] sm:$0xf]  ;;  %v1740_v18 = vld [vmem:[#allocation2 + $0x84] sm:$0xf] }
 0x258   : > { %1281 = vmatpush.bf16.msrb.mxu3 %v1653_v29  ;;  %1320 = vmatpush.bf16.msrb.mxu2 %v1657_v30  ;;  %v1573_v30 = vor.u32 %v1729_v19, %v1572_v61  ;;  %v1621_v31 = vor.u32 %v1741_v20, %v1620_v26  ;;  %v1577_v32 = vor.u32 %v1728_v22, %v1574_v63 }
 0x259   : > { %785 = vst [vmem:[#allocation2 + $0x30] sm:$0xff] %v781_v35  ;;  %v1021_v41 = vpack.c.bf16 %v1016_v38, %v1015_v37  ;;  %v1625_v33 = vor.u32 %v1740_v18, %v1622_v23  ;;  %v1564_v35 = vld [vmem:[#allocation2 + $0x10] sm:$0xf]  ;;  %v1725_v50 = vld [vmem:[#allocation2 + $0x4] sm:$0xf0] }
 0x25a   : > { %786 = vst [vmem:[#allocation2 + $0x38] sm:$0xff] %v782_v10  ;;  %v1557_v36 = vor.u32 %v1725_v50, %v1556_v58 }
 0x25b   : > { %1025 = vst [vmem:[#allocation2 + $0x110] sm:$0xff] %v1021_v41  ;;  %v730_v48 = vpop.permute.xlu1 %729 }
 0x25c   : > { %v734_v51 = vsel %vm306_vm10, %v2441_v9, %v730_v48  ;;  %v738_v53 = vsel %vm306_vm10, %v730_v48, %v2441_v9  ;;  %v1002_v28 = vpop.permute.xlu0 %1001  ;;  %1282 = vmatpush.bf16.msrb.mxu3 %v1645_v43  ;;  %1321 = vmatpush.bf16.msrb.mxu2 %v1649_v47  ;;  %v990_v48 = vpop.permute.xlu2 %989 }
 0x25d   : > { %v745_v54 = vmul.f32 %v2066_v14, %v738_v53  ;;  %v746_v55 = vmul.f32 %v2069_v15, %v734_v51  ;;  %v1006_v56 = vsel %vm449_vm11, %v2515_v44, %v1002_v28  ;;  %v1010_v57 = vsel %vm449_vm11, %v1002_v28, %v2515_v44  ;;  %v1628_v14 = vld [vmem:[#allocation2 + $0x90] sm:$0xf]  ;;  %v1630_v15 = vld [vmem:[#allocation2 + $0x98] sm:$0xf0]  ;;  %v2558_v44 = vld [vmem:[%s2600_s3] sm:$0xff] }
 0x25e   : > { %v1017_v13 = vmul.f32 %v2097_v45, %v1006_v56  ;;  %v1018_v9 = vmul.f32 %v2100_v46, %v1010_v57  ;;  %v1629_v12 = vor.u32 %v1743_v1, %v1628_v14  ;;  %v1633_v62 = vor.u32 %v1742_v17, %v1630_v15 }
 0x25f   : > { %v750_v0 = vpack.c.bf16 %v746_v55, %v745_v54  ;;  %v1074_v21 = vunpack.c.h.b16 %v2558_v44  ;;  %v1073_v51 = vunpack.c.l.b16 %v2558_v44  ;;  %v1558_v54 = vld [vmem:[#allocation2 + $0x8] sm:$0xf0] }
 0x260   : > { %v1022_v2 = vpack.c.bf16 %v1018_v9, %v1017_v13  ;;  %1283 = vmatpush.bf16.msrb.mxu3 %v1637_v59  ;;  %1322 = vmatpush.bf16.msrb.mxu2 %v1641_v60  ;;  %v1580_v3 = vld [vmem:[#allocation2 + $0x30] sm:$0xf]  ;;  %v1730_v4 = vld [vmem:[#allocation2 + $0x34] sm:$0xf]  ;;  %v1724_v13 = vld [vmem:[#allocation2 + $0x4] sm:$0xf] }
 0x261   : > { %754 = vst [vmem:[#allocation2 + $0x18] sm:$0xff] %v750_v0  ;;  %v1731_v6 = vld [vmem:[#allocation2 + $0x34] sm:$0xf0]  ;;  %v1582_v7 = vld [vmem:[#allocation2 + $0x38] sm:$0xf0]  ;;  %v1077_v10 = vpack.c.b16 %v1074_v21, %v1074_v21  ;;  %v1561_v60 = vor.u32 %v1724_v13, %v1558_v54  ;;  %v1076_v14 = vpack.c.b16 %v1073_v51, %v1073_v51 }
 0x262   : > { %1026 = vst [vmem:[#allocation2 + $0x118] sm:$0xff] %v1022_v2  ;;  %v1581_v11 = vor.u32 %v1731_v6, %v1580_v3  ;;  %v1585_v16 = vor.u32 %v1730_v4, %v1582_v7  ;;  %v1758_v42 = vld [vmem:[#allocation2 + $0x114] sm:$0xf]  ;;  %v1692_v9 = vld [vmem:[#allocation2 + $0x110] sm:$0xf] }
 0x263   : > { %v988_v52 = vpop.permute.xlu1 %987 }
 0x264   : > { %v996_v5 = vpop.permute.xlu0 %995  ;;  %1269 = vmatpush.bf16.msrb.mxu1 %v1581_v11  ;;  %1284 = vmatpush.bf16.msrb.mxu3 %v1629_v12  ;;  %v1069_v61 = vpop.permute.xlu2 %1068 }
 0x265   : > { %v1003_v24 = vsel %vm449_vm11, %v988_v52, %v996_v5  ;;  %v1007_v25 = vsel %vm449_vm11, %v996_v5, %v988_v52  ;;  %1308 = vmatpush.bf16.msrb.mxu0 %v1585_v16  ;;  %1323 = vmatpush.bf16.msrb.mxu2 %v1633_v62 }
 0x266   : > { %v1011_v27 = vmul.f32 %v2097_v45, %v1003_v24  ;;  %v1012_v29 = vmul.f32 %v2100_v46, %v1007_v25 }
 0x268   : > { %v1019_v37 = vpack.c.bf16 %v1012_v29, %v1011_v27  ;;  %1270 = vmatpush.bf16.msrb.mxu1 %v1573_v30  ;;  %1285 = vmatpush.bf16.msrb.mxu3 %v1621_v31  ;;  %v1727_v38 = vld [vmem:[#allocation2 + $0x14] sm:$0xf0]  ;;  %v1566_v40 = vld [vmem:[#allocation2 + $0x18] sm:$0xf0] }
 0x269   : > { %1309 = vmatpush.bf16.msrb.mxu0 %v1577_v32  ;;  %1324 = vmatpush.bf16.msrb.mxu2 %v1625_v33  ;;  %v1565_v41 = vor.u32 %v1727_v38, %v1564_v35  ;;  %v1569_v34 = vor.u32 %v1726_v39, %v1566_v40  ;;  %v1694_v43 = vld [vmem:[#allocation2 + $0x118] sm:$0xf0]  ;;  %v1759_v55 = vld [vmem:[#allocation2 + $0x114] sm:$0xf0] }
 0x26a   : > { %1023 = vst [vmem:[#allocation2 + $0x100] sm:$0xff] %v1019_v37  ;;  %v1697_v47 = vor.u32 %v1758_v42, %v1694_v43  ;;  %v1693_v0 = vor.u32 %v1759_v55, %v1692_v9 }
 0x26b   : > { %v998_v49 = vpop.permute.xlu1 %997  ;;  %1286 = vmatmul.bf16.vlgmr.msrb.gmra.mxu3 %v1077_v10 }
 0x26c   : > { %v1004_v53 = vsel %vm449_vm11, %v990_v48, %v998_v49  ;;  %v1008_v28 = vsel %vm449_vm11, %v998_v49, %v990_v48  ;;  %1271 = vmatpush.bf16.msrb.mxu1 %v1565_v41  ;;  %1336 = vmatpush.bf16.msra.mxu3 %v1697_v47 }
 0x26d   : > { %v1013_v56 = vmul.f32 %v2097_v45, %v1004_v53  ;;  %v1014_v57 = vmul.f32 %v2100_v46, %v1008_v28  ;;  %1310 = vmatpush.bf16.msrb.mxu0 %v1569_v34  ;;  %1325 = vmatmul.bf16.vlgmr.msrb.gmra.mxu2 %v1077_v10  ;;  %v1075_v45 = vunpack.c.l.b16 %v1028_v8 }
 0x26f   : > { %v1020_v59 = vpack.c.bf16 %v1014_v57, %v1013_v56  ;;  %v1078_v44 = vpack.c.b16 %v1075_v45, %v1075_v45 }
 0x270   : > { %1272 = vmatpush.bf16.msrb.mxu1 %v1557_v36 }
 0x271   : > { %1024 = vst [vmem:[#allocation2 + $0x108] sm:$0xff] %v1020_v59  ;;  %1311 = vmatpush.bf16.msrb.mxu0 %v1561_v60  ;;  %v1684_v46 = vld [vmem:[#allocation2 + $0x100] sm:$0xf]  ;;  %v1756_v15 = vld [vmem:[#allocation2 + $0x104] sm:$0xf] }
 0x273   : > { %1273 = vmatmul.bf16.vlgmr.msrb.gmra.mxu1 %v1076_v14 }
 0x274   : > { %1297 = vmatpush.bf16.msra.mxu1 %v1693_v0  ;;  %1312 = vmatmul.bf16.vlgmr.msrb.gmra.mxu0 %v1076_v14 }
 0x278   : > { %v1757_v1 = vld [vmem:[#allocation2 + $0x104] sm:$0xf0]  ;;  %v1686_v2 = vld [vmem:[#allocation2 + $0x108] sm:$0xf0] }
 0x279   : > { %v1685_v3 = vor.u32 %v1757_v1, %v1684_v46  ;;  %v1689_v4 = vor.u32 %v1756_v15, %v1686_v2 }
 0x27b   : > { %1298 = vmatpush.bf16.msra.mxu1 %v1685_v3  ;;  %1337 = vmatpush.bf16.msra.mxu3 %v1689_v4 }
 0x27e   : > { %1699 = vmatmul.msk.bf16.vlgmr.msra.gmra.mxu3 %vm1261_vm2, %v1078_v44 }
 0x283   : > { %1698 = vmatmul.msk.bf16.vlgmr.msra.gmra.mxu1 %vm1261_vm2, %v1078_v44 }
 0x2ee   : > { %v1287_v6 = vpop.f32.mrf.mxu3 }
 0x2f0   : > { %v1274_v7 = vpop.f32.mrf.mxu1  ;;  %v1326_v11 = vpop.f32.mrf.mxu2 }
 0x2f1   : > { %v1313_v12 = vpop.f32.mrf.mxu0  ;;  %v1275_v19 = vadd.f32 %v1274_v7, %v1069_v61 }
 0x2f2   : > { %v1314_v20 = vadd.f32 %v1313_v12, %v1069_v61 }
 0x2f3   : > { %v1288_v21 = vadd.f32 %v1287_v6, %v1275_v19 }
 0x2f4   : > { %v1327_v5 = vadd.f32 %v1326_v11, %v1314_v20 }
 0x2f6   : > { %v1289_v16 = vpop.f32.mrf.mxu3 }
 0x2f8   : > { %v1276_v17 = vpop.f32.mrf.mxu1  ;;  %v1328_v52 = vpop.f32.mrf.mxu2 }
 0x2f9   : > { %v1315_v62 = vpop.f32.mrf.mxu0 }
 0x300   : > { %v1300_v22 = vpop.f32.mrf.mxu1 }
 0x301   : > { %v1301_v63 = vadd.f32 %v1300_v22, %v1288_v21  ;;  %v1339_v23 = vpop.f32.mrf.mxu3 }
 0x302   : > { %v1340_v24 = vadd.f32 %v1339_v23, %v1327_v5 }
 0x303   : > { %1874 = vtanh.f32 %v1301_v63 }
 0x304   : > { %1876 = vtanh.f32 %v1340_v24 }
 0x308   : > { %v1302_v25 = vpop.f32.mrf.mxu1 }
 0x309   : > { %v1875_v26 = vpop.eup %1874  ;;  %v1341_v27 = vpop.f32.mrf.mxu3 }
 0x30a   : > { %v1877_v29 = vpop.eup %1876  ;;  %1347 = vrot.lane.b32.xlu0 %v1875_v26, %s1928_s14 }
 0x30b   : > { %1349 = vrot.lane.b32.xlu1 %v1877_v29, %s1928_s14 }
 0x37c   : > { %v1348_v30 = vpop.permute.xlu0 %1347 }
 0x37d   : > { %v1350_v31 = vpop.permute.xlu1 %1349 }
 0x37e   : > { %v1352_v18 = vsel %vm1351_vm3, %v1348_v30, %v1350_v31 }
 0x37f   : > { %1354 = vst [vmem:[%s258_s26] sm:$0xff] %v1352_v18 }
 0x380 PF: > { %s15_s22 = sadd.s32 1, %s1916_s22   ;;  %s2606_s18 = smov %s1908_s20 }
 0x381   : > { %p12_p7 = scmp.ge.s32.totalorder %s15_s22, 6   ;;  %s2607_s19 = smov %s1912_s21 }
 0x382   : > { %s2608_s20 = smov %s2611_s23  ;;  %s2609_s21 = smov %s2615_s24 }
 0x383   :  { %14 = sbr.rel (!%p12_p7) target bundleno = 3 (0x3), region = 70 }

</bundles_post_ra>
